<compile_context>
chip_gen: v7x
topology: tpu7x:2x2x1
jax: 0.10.0
libtpu: 0.0.40
codegen_flags: <defaults>
</compile_context>

<pallas_src>
import jax
import jax.numpy as jnp
from jax.experimental import pallas as pl
from jax.experimental.pallas import tpu as pltpu


def _relu_kernel(x_ref, o_ref):
    # One VPU max per vreg; no materialized zeros operand.
    o_ref[...] = jnp.maximum(x_ref[...], 0.0)


def _pick_block_rows(rows, cols, itemsize, max_block_bytes=1 << 20):
    """Pick a block-row count that divides `rows` exactly (no pad / no slice),
    is a multiple of 8 (sublane tiling) unless it is the whole array, keeps the
    block under ~1 MiB, and yields a small, even grid (megacore-friendly)."""
    for steps in (1, 2, 4, 8, 16, 32, 64, 128, 256):
        if rows % steps:
            continue
        br = rows // steps
        if br != rows and br % 8 != 0:
            continue
        if br * cols * itemsize <= max_block_bytes:
            return br
    return rows  # fallback: single whole-array block (small inputs)


def relu_pallas(x):
    """ReLU matching torch.nn.functional.relu(x21, inplace=True)."""
    orig_shape = x.shape
    cols = orig_shape[-1]
    rows = x.size // cols
    slab = x.reshape(rows, cols)  # free row-major view, no copy, no padding

    block_rows = _pick_block_rows(rows, cols, x.dtype.itemsize)
    grid = (rows // block_rows,)

    out = pl.pallas_call(
        _relu_kernel,
        out_shape=jax.ShapeDtypeStruct(slab.shape, x.dtype),
        grid=grid,
        in_specs=[pl.BlockSpec((block_rows, cols), lambda i: (i, 0))],
        out_specs=pl.BlockSpec((block_rows, cols), lambda i: (i, 0)),
        input_output_aliases={0: 0},  # reuse the input's HBM buffer (inplace)
        compiler_params=pltpu.CompilerParams(
            dimension_semantics=("parallel",),  # even split across TCs on v7x
        ),
    )(slab)

    return out.reshape(orig_shape)


if __name__ == "__main__":
    # Deterministic input matching the module's forward:
    # x21 ~ N(0, 1), shape [1, 64, 109, 109], float32 (NCHW, same as PyTorch).
    key = jax.random.PRNGKey(0)
    x21 = jax.random.normal(key, (1, 64, 109, 109), dtype=jnp.float32)

    # Reference materialized BEFORE x21 is donated to the kernel.
    ref = jax.block_until_ready(jnp.maximum(x21, 0.0))
    x_shape, x_dtype = x21.shape, x21.dtype

    relu = jax.jit(relu_pallas, donate_argnums=0)  # true in-place: donate + alias
    out = jax.block_until_ready(relu(x21))

    # Correctness check against plain-JAX reference (ReLU is exact).
    assert out.shape == x_shape and out.dtype == x_dtype
    assert bool(jnp.all(out == ref))

    print("KERNEL_OK")
</pallas_src>

<mosaic_0001>
module attributes {stable_mosaic.version = 11 : i64} {
  func.func @_relu_kernel(%arg0: i32, %arg1: memref<1744x109xf32, #tpu.memory_space<vmem>>, %arg2: memref<1744x109xf32, #tpu.memory_space<vmem>>) attributes {dimension_semantics = [#tpu.dimension_semantics<parallel>], iteration_bounds = array<i64: 4>, scalar_prefetch = 0 : i64, scratch_operands = 0 : i64, tpu.core_type = #tpu.core_type<tc>, window_params = [{transform_indices = @transform_0, window_bounds = array<i64: 1744, 109>}, {transform_indices = @transform_1, window_bounds = array<i64: 1744, 109>}]} {
    %c0 = arith.constant 0 : index
    %c0_0 = arith.constant 0 : index
    %0 = vector.load %arg1[%c0, %c0_0] : memref<1744x109xf32, #tpu.memory_space<vmem>>, vector<1744x109xf32>
    %cst = arith.constant 0.000000e+00 : f32
    %1 = vector.broadcast %cst : f32 to vector<1744x109xf32>
    %2 = arith.maximumf %0, %1 : vector<1744x109xf32>
    %c0_1 = arith.constant 0 : index
    %c0_2 = arith.constant 0 : index
    %3 = vector.load %arg2[%c0_1, %c0_2] : memref<1744x109xf32, #tpu.memory_space<vmem>>, vector<1744x109xf32>
    tpu.vector_store %arg2[%c0_1, %c0_2], %2 {strides = array<i32>} : memref<1744x109xf32, #tpu.memory_space<vmem>>, vector<1744x109xf32>,
    return
  }
  func.func @transform_0(%arg0: i32) -> (i32, i32) {
    %c0_i32 = arith.constant 0 : i32
    %c0_i32_0 = arith.constant 0 : i32
    return %arg0, %c0_i32 : i32, i32
  }
  func.func @transform_1(%arg0: i32) -> (i32, i32) {
    %c0_i32 = arith.constant 0 : i32
    %c0_i32_0 = arith.constant 0 : i32
    return %arg0, %c0_i32 : i32, i32
  }
}

</mosaic_0001>

<bundles_post_ra>
// kernel: relu_pallas.1
= control target key start
LH: loop header
LB: loop body
LE: loop exit
PB: predicated region body
PF: predicated region fallthrough
CT: control target
= control target key end

     0   :  { %s866_s6 = smov 0   ;;  %s2634_s0 = inlined_call_operand.vmem [shape: f32[6976,109], index: 0, kind: input, shape index: {}, may-alias: {0,1}]   ;;  %s2635_s1 = inlined_call_operand.vmem [shape: f32[6976,109], index: 1, kind: output, shape index: {}, may-alias: {0,1}]  }
   0x1 LB: > { %s831_s7 = sadd.s32 4294967295, %s854_s6   ;;  %p835_p0 = scmp.ge.s32.totalorder %s854_s6, 1  ;;  %s854_s6 = sphi %s866_s6, %s11_s6  }
   0x2   : > { %p88_p1 = scmp.lt.s32.totalorder %s854_s6, 5 }
   0x4   : > { %p89_p2 = pnand %p835_p0, %p88_p1 }
   0x6   : > { %92 = sbr.rel (%p89_p2) target bundleno = 229 (0xe5), region = 24 }
   0xd   : > { %s108_s8 = smul.u32 218, %s831_s7  ;;  %vm556_vm0 = vcmask 891904  }
   0xf   : > { %p109_p3 = scmp.lt.s32.totalorder %s108_s8, 871 }
  0x11   : > { %s3330_s8 = smov (!%p109_p3, %s108_s8), 871 }
  0x12   : > { %s836_s9 = sshll.u32 %s3330_s8, 3 }
  0x13   : > { %s882_s12 = scalar_lea.vmem %s2634_s0, %s836_s9  ;;  %s1726_s15 = scalar_lea.vmem %s2635_s1, %s836_s9 }
  0x14   : > { %v885_v0 = vld [vmem:[%s882_s12] sm:$0xff]  ;;  %v888_v1 = vld [vmem:[%s882_s12 + $0x8] sm:$0xff]  ;;  %v891_v2 = vld [vmem:[%s882_s12 + $0x10] sm:$0xff] }
  0x15   : > { %v894_v3 = vld [vmem:[%s882_s12 + $0x18] sm:$0xff]  ;;  %v897_v4 = vld [vmem:[%s882_s12 + $0x20] sm:$0xff]  ;;  %v900_v5 = vld [vmem:[%s882_s12 + $0x28] sm:$0xff] }
  0x16   : > { %v906_v9 = vld [vmem:[%s882_s12 + $0x30] sm:$0xff]  ;;  %v909_v10 = vld [vmem:[%s882_s12 + $0x38] sm:$0xff]  ;;  %v912_v11 = vld [vmem:[%s882_s12 + $0x40] sm:$0xff] }
  0x17   : > { %v918_v15 = vld [vmem:[%s882_s12 + $0x48] sm:$0xff]  ;;  %v921_v16 = vld [vmem:[%s882_s12 + $0x50] sm:$0xff]  ;;  %v924_v17 = vld [vmem:[%s882_s12 + $0x58] sm:$0xff] }
  0x18   : > { %v930_v21 = vld [vmem:[%s882_s12 + $0x60] sm:$0xff]  ;;  %v933_v22 = vld [vmem:[%s882_s12 + $0x68] sm:$0xff]  ;;  %v936_v23 = vld [vmem:[%s882_s12 + $0x70] sm:$0xff] }
  0x19   : > { %v942_v27 = vld [vmem:[%s882_s12 + $0x78] sm:$0xff]  ;;  %v945_v28 = vld [vmem:[%s882_s12 + $0x80] sm:$0xff]  ;;  %v948_v29 = vld [vmem:[%s882_s12 + $0x88] sm:$0xff] }
  0x1a   : > { %v954_v33 = vld [vmem:[%s882_s12 + $0x90] sm:$0xff]  ;;  %v957_v34 = vld [vmem:[%s882_s12 + $0x98] sm:$0xff]  ;;  %v960_v35 = vld [vmem:[%s882_s12 + $0xa0] sm:$0xff] }
  0x1b   : > { %v966_v39 = vld [vmem:[%s882_s12 + $0xa8] sm:$0xff]  ;;  %v969_v40 = vld [vmem:[%s882_s12 + $0xb0] sm:$0xff]  ;;  %v972_v41 = vld [vmem:[%s882_s12 + $0xb8] sm:$0xff] }
  0x1c   : > { %v978_v45 = vld [vmem:[%s882_s12 + $0xc0] sm:$0xff]  ;;  %v981_v46 = vld [vmem:[%s882_s12 + $0xc8] sm:$0xff]  ;;  %v984_v47 = vld [vmem:[%s882_s12 + $0xd0] sm:$0xff] }
  0x1d   : > { %v990_v51 = vld [vmem:[%s882_s12 + $0xd8] sm:$0xff]  ;;  %v993_v52 = vld [vmem:[%s882_s12 + $0xe0] sm:$0xff]  ;;  %v996_v53 = vld [vmem:[%s882_s12 + $0xe8] sm:$0xff] }
  0x1e   : > { %v1002_v57 = vld [vmem:[%s882_s12 + $0xf0] sm:$0xff]  ;;  %v1005_v58 = vld [vmem:[%s882_s12 + $0xf8] sm:$0xff]  ;;  %v1008_v59 = vld [vmem:[%s882_s12 + $0x100] sm:$0xff] }
  0x1f   : > { %v1014_v63 = vld [vmem:[%s882_s12 + $0x108] sm:$0xff]  ;;  %v1017_v55 = vld [vmem:[%s882_s12 + $0x110] sm:$0xff]  ;;  %v1020_v56 = vld [vmem:[%s882_s12 + $0x118] sm:$0xff] }
  0x20   : > { %v1026_v49 = vld [vmem:[%s882_s12 + $0x120] sm:$0xff]  ;;  %v1029_v61 = vld [vmem:[%s882_s12 + $0x128] sm:$0xff]  ;;  %v1032_v62 = vld [vmem:[%s882_s12 + $0x130] sm:$0xff] }
  0x21   : > { %v1038_v43 = vld [vmem:[%s882_s12 + $0x138] sm:$0xff]  ;;  %v1041_v50 = vld [vmem:[%s882_s12 + $0x140] sm:$0xff]  ;;  %v1044_v60 = vld [vmem:[%s882_s12 + $0x148] sm:$0xff] }
  0x22   : > { %v1050_v37 = vld [vmem:[%s882_s12 + $0x150] sm:$0xff]  ;;  %v1053_v44 = vld [vmem:[%s882_s12 + $0x158] sm:$0xff]  ;;  %v1056_v54 = vld [vmem:[%s882_s12 + $0x160] sm:$0xff] }
  0x23   : > { %v1062_v31 = vld [vmem:[%s882_s12 + $0x168] sm:$0xff]  ;;  %v1065_v38 = vld [vmem:[%s882_s12 + $0x170] sm:$0xff]  ;;  %v1068_v48 = vld [vmem:[%s882_s12 + $0x178] sm:$0xff] }
  0x24   : > { %v1074_v25 = vld [vmem:[%s882_s12 + $0x180] sm:$0xff]  ;;  %v1077_v32 = vld [vmem:[%s882_s12 + $0x188] sm:$0xff]  ;;  %v1080_v42 = vld [vmem:[%s882_s12 + $0x190] sm:$0xff] }
  0x25   : > { %2795 = vst [vmem:[#allocation2_spill] sm:$0xff] %v1080_v42  ;;  %v1086_v19 = vld [vmem:[%s882_s12 + $0x198] sm:$0xff]  ;;  %v1089_v26 = vld [vmem:[%s882_s12 + $0x1a0] sm:$0xff]  ;;  %v1092_v36 = vld [vmem:[%s882_s12 + $0x1a8] sm:$0xff] }
  0x26   : > { %2796 = vst [vmem:[#allocation3_spill] sm:$0xff] %v1086_v19  ;;  %2797 = vst [vmem:[#allocation4_spill] sm:$0xff] %v1089_v26  ;;  %v1098_v13 = vld [vmem:[%s882_s12 + $0x1b0] sm:$0xff]  ;;  %v1101_v20 = vld [vmem:[%s882_s12 + $0x1b8] sm:$0xff] }
  0x27   : > { %2798 = vst [vmem:[#allocation5_spill] sm:$0xff] %v1092_v36  ;;  %2799 = vst [vmem:[#allocation6_spill] sm:$0xff] %v1098_v13  ;;  %v1104_v30 = vld [vmem:[%s882_s12 + $0x1c0] sm:$0xff]  ;;  %v1110_v7 = vld [vmem:[%s882_s12 + $0x1c8] sm:$0xff] }
  0x28   : > { %2800 = vst [vmem:[#allocation7_spill] sm:$0xff] %v1101_v20  ;;  %2801 = vst [vmem:[#allocation8_spill] sm:$0xff] %v1104_v30  ;;  %v1113_v14 = vld [vmem:[%s882_s12 + $0x1d0] sm:$0xff]  ;;  %v1116_v24 = vld [vmem:[%s882_s12 + $0x1d8] sm:$0xff] }
  0x29   : > { %2802 = vst [vmem:[#allocation9_spill] sm:$0xff] %v1110_v7  ;;  %2803 = vst [vmem:[#allocation10_spill] sm:$0xff] %v1113_v14  ;;  %v1122_v19 = vld [vmem:[%s882_s12 + $0x1e0] sm:$0xff]  ;;  %v1125_v8 = vld [vmem:[%s882_s12 + $0x1e8] sm:$0xff] }
  0x2a   : > { %2804 = vst [vmem:[#allocation11_spill] sm:$0xff] %v1116_v24  ;;  %2805 = vst [vmem:[#allocation12_spill] sm:$0xff] %v1122_v19  ;;  %v1128_v18 = vld [vmem:[%s882_s12 + $0x1f0] sm:$0xff]  ;;  %v1134_v13 = vld [vmem:[%s882_s12 + $0x1f8] sm:$0xff] }
  0x2b   : > { %2806 = vst [vmem:[#allocation13_spill] sm:$0xff] %v1125_v8  ;;  %2807 = vst [vmem:[#allocation14_spill] sm:$0xff] %v1128_v18  ;;  %v1137_v42 = vld [vmem:[%s882_s12 + $0x200] sm:$0xff]  ;;  %v1140_v12 = vld [vmem:[%s882_s12 + $0x208] sm:$0xff] }
  0x2c   : > { %2808 = vst [vmem:[#allocation15_spill] sm:$0xff] %v1134_v13  ;;  %2809 = vst [vmem:[#allocation16_spill] sm:$0xff] %v1137_v42  ;;  %v1146_v7 = vld [vmem:[%s882_s12 + $0x210] sm:$0xff]  ;;  %v1149_v26 = vld [vmem:[%s882_s12 + $0x218] sm:$0xff] }
  0x2d   : > { %2810 = vst [vmem:[#allocation17_spill] sm:$0xff] %v1140_v12  ;;  %2811 = vst [vmem:[#allocation18_spill] sm:$0xff] %v1146_v7  ;;  %v1152_v6 = vld [vmem:[%s882_s12 + $0x220] sm:$0xff]  ;;  %v1158_v19 = vld [vmem:[%s882_s12 + $0x228] sm:$0xff] }
  0x2e   : > { %2812 = vst [vmem:[#allocation19_spill] sm:$0xff] %v1149_v26  ;;  %2813 = vst [vmem:[#allocation20_spill] sm:$0xff] %v1152_v6  ;;  %v1161_v20 = vld [vmem:[%s882_s12 + $0x230] sm:$0xff]  ;;  %v1164_v36 = vld [vmem:[%s882_s12 + $0x238] sm:$0xff] }
  0x2f   : > { %2814 = vst [vmem:[#allocation21_spill] sm:$0xff] %v1158_v19  ;;  %2815 = vst [vmem:[#allocation22_spill] sm:$0xff] %v1161_v20  ;;  %v1170_v13 = vld [vmem:[%s882_s12 + $0x240] sm:$0xff]  ;;  %v1173_v14 = vld [vmem:[%s882_s12 + $0x248] sm:$0xff] }
  0x30   : > { %2816 = vst [vmem:[#allocation23_spill] sm:$0xff] %v1164_v36  ;;  %2817 = vst [vmem:[#allocation24_spill] sm:$0xff] %v1170_v13  ;;  %v1176_v30 = vld [vmem:[%s882_s12 + $0x250] sm:$0xff]  ;;  %v1182_v7 = vld [vmem:[%s882_s12 + $0x258] sm:$0xff] }
  0x31   : > { %2818 = vst [vmem:[#allocation25_spill] sm:$0xff] %v1173_v14  ;;  %2819 = vst [vmem:[#allocation26_spill] sm:$0xff] %v1176_v30  ;;  %v1185_v8 = vld [vmem:[%s882_s12 + $0x260] sm:$0xff]  ;;  %v1188_v24 = vld [vmem:[%s882_s12 + $0x268] sm:$0xff] }
  0x32   : > { %2820 = vst [vmem:[#allocation27_spill] sm:$0xff] %v1182_v7  ;;  %2821 = vst [vmem:[#allocation28_spill] sm:$0xff] %v1185_v8  ;;  %v1194_v19 = vld [vmem:[%s882_s12 + $0x270] sm:$0xff]  ;;  %v1197_v42 = vld [vmem:[%s882_s12 + $0x278] sm:$0xff] }
  0x33   : > { %2822 = vst [vmem:[#allocation29_spill] sm:$0xff] %v1188_v24  ;;  %2823 = vst [vmem:[#allocation30_spill] sm:$0xff] %v1194_v19  ;;  %v1200_v18 = vld [vmem:[%s882_s12 + $0x280] sm:$0xff]  ;;  %v1206_v13 = vld [vmem:[%s882_s12 + $0x288] sm:$0xff] }
  0x34   : > { %2824 = vst [vmem:[#allocation31_spill] sm:$0xff] %v1197_v42  ;;  %2825 = vst [vmem:[#allocation32_spill] sm:$0xff] %v1200_v18  ;;  %v1209_v26 = vld [vmem:[%s882_s12 + $0x290] sm:$0xff]  ;;  %v1212_v12 = vld [vmem:[%s882_s12 + $0x298] sm:$0xff] }
  0x35   : > { %2826 = vst [vmem:[#allocation33_spill] sm:$0xff] %v1206_v13  ;;  %2827 = vst [vmem:[#allocation34_spill] sm:$0xff] %v1209_v26  ;;  %v1218_v7 = vld [vmem:[%s882_s12 + $0x2a0] sm:$0xff]  ;;  %v1221_v20 = vld [vmem:[%s882_s12 + $0x2a8] sm:$0xff] }
  0x36   : > { %2828 = vst [vmem:[#allocation35_spill] sm:$0xff] %v1212_v12  ;;  %2829 = vst [vmem:[#allocation36_spill] sm:$0xff] %v1218_v7  ;;  %v1224_v6 = vld [vmem:[%s882_s12 + $0x2b0] sm:$0xff]  ;;  %v1230_v19 = vld [vmem:[%s882_s12 + $0x2b8] sm:$0xff] }
  0x37   : > { %2830 = vst [vmem:[#allocation37_spill] sm:$0xff] %v1221_v20  ;;  %2831 = vst [vmem:[#allocation38_spill] sm:$0xff] %v1224_v6  ;;  %v1233_v14 = vld [vmem:[%s882_s12 + $0x2c0] sm:$0xff]  ;;  %v1236_v36 = vld [vmem:[%s882_s12 + $0x2c8] sm:$0xff] }
  0x38   : > { %2832 = vst [vmem:[#allocation39_spill] sm:$0xff] %v1230_v19  ;;  %2833 = vst [vmem:[#allocation40_spill] sm:$0xff] %v1233_v14  ;;  %v1242_v13 = vld [vmem:[%s882_s12 + $0x2d0] sm:$0xff]  ;;  %v1245_v8 = vld [vmem:[%s882_s12 + $0x2d8] sm:$0xff] }
  0x39   : > { %2834 = vst [vmem:[#allocation41_spill] sm:$0xff] %v1236_v36  ;;  %2835 = vst [vmem:[#allocation42_spill] sm:$0xff] %v1242_v13  ;;  %v1248_v30 = vld [vmem:[%s882_s12 + $0x2e0] sm:$0xff]  ;;  %v1254_v7 = vld [vmem:[%s882_s12 + $0x2e8] sm:$0xff] }
  0x3a   : > { %2836 = vst [vmem:[#allocation43_spill] sm:$0xff] %v1245_v8  ;;  %2837 = vst [vmem:[#allocation44_spill] sm:$0xff] %v1248_v30  ;;  %v1257_v42 = vld [vmem:[%s882_s12 + $0x2f0] sm:$0xff]  ;;  %v1260_v24 = vld [vmem:[%s882_s12 + $0x2f8] sm:$0xff] }
  0x3b   : > { %2838 = vst [vmem:[#allocation45_spill] sm:$0xff] %v1254_v7  ;;  %2839 = vst [vmem:[#allocation46_spill] sm:$0xff] %v1257_v42  ;;  %v1266_v19 = vld [vmem:[%s882_s12 + $0x300] sm:$0xff]  ;;  %v1269_v26 = vld [vmem:[%s882_s12 + $0x308] sm:$0xff] }
  0x3c   : > { %2840 = vst [vmem:[#allocation47_spill] sm:$0xff] %v1260_v24  ;;  %2841 = vst [vmem:[#allocation48_spill] sm:$0xff] %v1266_v19  ;;  %v1272_v18 = vld [vmem:[%s882_s12 + $0x310] sm:$0xff]  ;;  %v1278_v13 = vld [vmem:[%s882_s12 + $0x318] sm:$0xff] }
  0x3d   : > { %2842 = vst [vmem:[#allocation49_spill] sm:$0xff] %v1269_v26  ;;  %2843 = vst [vmem:[#allocation50_spill] sm:$0xff] %v1272_v18  ;;  %v1281_v20 = vld [vmem:[%s882_s12 + $0x320] sm:$0xff]  ;;  %v1284_v12 = vld [vmem:[%s882_s12 + $0x328] sm:$0xff] }
  0x3e   : > { %2844 = vst [vmem:[#allocation51_spill] sm:$0xff] %v1278_v13  ;;  %2845 = vst [vmem:[#allocation52_spill] sm:$0xff] %v1281_v20  ;;  %v1290_v7 = vld [vmem:[%s882_s12 + $0x330] sm:$0xff]  ;;  %v1293_v14 = vld [vmem:[%s882_s12 + $0x338] sm:$0xff] }
  0x3f   : > { %2846 = vst [vmem:[#allocation53_spill] sm:$0xff] %v1284_v12  ;;  %2847 = vst [vmem:[#allocation54_spill] sm:$0xff] %v1290_v7  ;;  %v1296_v6 = vld [vmem:[%s882_s12 + $0x340] sm:$0xff]  ;;  %v1302_v19 = vld [vmem:[%s882_s12 + $0x348] sm:$0xff] }
  0x40   : > { %2848 = vst [vmem:[#allocation55_spill] sm:$0xff] %v1293_v14  ;;  %2849 = vst [vmem:[#allocation56_spill] sm:$0xff] %v1296_v6  ;;  %v1305_v8 = vld [vmem:[%s882_s12 + $0x350] sm:$0xff]  ;;  %v1308_v36 = vld [vmem:[%s882_s12 + $0x358] sm:$0xff] }
  0x41   : > { %2850 = vst [vmem:[#allocation57_spill] sm:$0xff] %v1302_v19  ;;  %2851 = vst [vmem:[#allocation58_spill] sm:$0xff] %v1305_v8  ;;  %v1314_v13 = vld [vmem:[%s882_s12 + $0x360] sm:$0xff]  ;;  %v1317_v42 = vld [vmem:[%s882_s12 + $0x368] sm:$0xff] }
  0x42   : > { %2852 = vst [vmem:[#allocation59_spill] sm:$0xff] %v1308_v36  ;;  %2853 = vst [vmem:[#allocation60_spill] sm:$0xff] %v1314_v13  ;;  %v1320_v30 = vld [vmem:[%s882_s12 + $0x370] sm:$0xff]  ;;  %v1326_v7 = vld [vmem:[%s882_s12 + $0x378] sm:$0xff] }
  0x43   : > { %2854 = vst [vmem:[#allocation61_spill] sm:$0xff] %v1317_v42  ;;  %2855 = vst [vmem:[#allocation62_spill] sm:$0xff] %v1320_v30  ;;  %v1329_v26 = vld [vmem:[%s882_s12 + $0x380] sm:$0xff]  ;;  %v1332_v24 = vld [vmem:[%s882_s12 + $0x388] sm:$0xff] }
  0x44   : > { %2856 = vst [vmem:[#allocation63_spill] sm:$0xff] %v1326_v7  ;;  %2857 = vst [vmem:[#allocation64_spill] sm:$0xff] %v1329_v26  ;;  %v1338_v19 = vld [vmem:[%s882_s12 + $0x390] sm:$0xff]  ;;  %v1341_v20 = vld [vmem:[%s882_s12 + $0x398] sm:$0xff] }
  0x45   : > { %2858 = vst [vmem:[#allocation65_spill] sm:$0xff] %v1332_v24  ;;  %2859 = vst [vmem:[#allocation66_spill] sm:$0xff] %v1338_v19  ;;  %v1344_v18 = vld [vmem:[%s882_s12 + $0x3a0] sm:$0xff]  ;;  %v1350_v13 = vld [vmem:[%s882_s12 + $0x3a8] sm:$0xff] }
  0x46   : > { %2860 = vst [vmem:[#allocation67_spill] sm:$0xff] %v1341_v20  ;;  %2861 = vst [vmem:[#allocation68_spill] sm:$0xff] %v1344_v18  ;;  %v1353_v14 = vld [vmem:[%s882_s12 + $0x3b0] sm:$0xff]  ;;  %v1356_v12 = vld [vmem:[%s882_s12 + $0x3b8] sm:$0xff] }
  0x47   : > { %2862 = vst [vmem:[#allocation69_spill] sm:$0xff] %v1350_v13  ;;  %2863 = vst [vmem:[#allocation70_spill] sm:$0xff] %v1353_v14  ;;  %v1362_v7 = vld [vmem:[%s882_s12 + $0x3c0] sm:$0xff]  ;;  %v1365_v8 = vld [vmem:[%s882_s12 + $0x3c8] sm:$0xff] }
  0x48   : > { %2864 = vst [vmem:[#allocation71_spill] sm:$0xff] %v1356_v12  ;;  %2865 = vst [vmem:[#allocation72_spill] sm:$0xff] %v1362_v7  ;;  %v1368_v6 = vld [vmem:[%s882_s12 + $0x3d0] sm:$0xff]  ;;  %v1374_v19 = vld [vmem:[%s882_s12 + $0x3d8] sm:$0xff] }
  0x49   : > { %2866 = vst [vmem:[#allocation73_spill] sm:$0xff] %v1365_v8  ;;  %2867 = vst [vmem:[#allocation74_spill] sm:$0xff] %v1368_v6  ;;  %v1377_v42 = vld [vmem:[%s882_s12 + $0x3e0] sm:$0xff]  ;;  %v1380_v36 = vld [vmem:[%s882_s12 + $0x3e8] sm:$0xff] }
  0x4a   : > { %2868 = vst [vmem:[#allocation75_spill] sm:$0xff] %v1374_v19  ;;  %2869 = vst [vmem:[#allocation76_spill] sm:$0xff] %v1377_v42  ;;  %v1386_v13 = vld [vmem:[%s882_s12 + $0x3f0] sm:$0xff]  ;;  %v1389_v26 = vld [vmem:[%s882_s12 + $0x3f8] sm:$0xff] }
  0x4b   : > { %2870 = vst [vmem:[#allocation77_spill] sm:$0xff] %v1380_v36  ;;  %2871 = vst [vmem:[#allocation78_spill] sm:$0xff] %v1386_v13  ;;  %v1392_v30 = vld [vmem:[%s882_s12 + $0x400] sm:$0xff]  ;;  %v1398_v7 = vld [vmem:[%s882_s12 + $0x408] sm:$0xff] }
  0x4c   : > { %2872 = vst [vmem:[#allocation79_spill] sm:$0xff] %v1389_v26  ;;  %2873 = vst [vmem:[#allocation80_spill] sm:$0xff] %v1392_v30  ;;  %v1401_v20 = vld [vmem:[%s882_s12 + $0x410] sm:$0xff]  ;;  %v1404_v24 = vld [vmem:[%s882_s12 + $0x418] sm:$0xff] }
  0x4d   : > { %2874 = vst [vmem:[#allocation81_spill] sm:$0xff] %v1398_v7  ;;  %2875 = vst [vmem:[#allocation82_spill] sm:$0xff] %v1401_v20  ;;  %v1410_v19 = vld [vmem:[%s882_s12 + $0x420] sm:$0xff]  ;;  %v1413_v14 = vld [vmem:[%s882_s12 + $0x428] sm:$0xff] }
  0x4e   : > { %2876 = vst [vmem:[#allocation83_spill] sm:$0xff] %v1404_v24  ;;  %2877 = vst [vmem:[#allocation84_spill] sm:$0xff] %v1410_v19  ;;  %v1416_v18 = vld [vmem:[%s882_s12 + $0x430] sm:$0xff]  ;;  %v1422_v13 = vld [vmem:[%s882_s12 + $0x438] sm:$0xff] }
  0x4f   : > { %2878 = vst [vmem:[#allocation85_spill] sm:$0xff] %v1413_v14  ;;  %2879 = vst [vmem:[#allocation86_spill] sm:$0xff] %v1416_v18  ;;  %v1425_v8 = vld [vmem:[%s882_s12 + $0x440] sm:$0xff]  ;;  %v1428_v12 = vld [vmem:[%s882_s12 + $0x448] sm:$0xff] }
  0x50   : > { %2880 = vst [vmem:[#allocation87_spill] sm:$0xff] %v1422_v13  ;;  %2881 = vst [vmem:[#allocation88_spill] sm:$0xff] %v1425_v8  ;;  %v1434_v7 = vld [vmem:[%s882_s12 + $0x450] sm:$0xff]  ;;  %v1437_v42 = vld [vmem:[%s882_s12 + $0x458] sm:$0xff] }
  0x51   : > { %2882 = vst [vmem:[#allocation89_spill] sm:$0xff] %v1428_v12  ;;  %2883 = vst [vmem:[#allocation90_spill] sm:$0xff] %v1434_v7  ;;  %v1440_v6 = vld [vmem:[%s882_s12 + $0x460] sm:$0xff]  ;;  %v1446_v19 = vld [vmem:[%s882_s12 + $0x468] sm:$0xff] }
  0x52   : > { %2884 = vst [vmem:[#allocation91_spill] sm:$0xff] %v1437_v42  ;;  %2885 = vst [vmem:[#allocation92_spill] sm:$0xff] %v1440_v6  ;;  %v1449_v26 = vld [vmem:[%s882_s12 + $0x470] sm:$0xff]  ;;  %v1452_v36 = vld [vmem:[%s882_s12 + $0x478] sm:$0xff] }
  0x53   : > { %2886 = vst [vmem:[#allocation93_spill] sm:$0xff] %v1446_v19  ;;  %2887 = vst [vmem:[#allocation94_spill] sm:$0xff] %v1449_v26  ;;  %v1458_v13 = vld [vmem:[%s882_s12 + $0x480] sm:$0xff]  ;;  %v1461_v20 = vld [vmem:[%s882_s12 + $0x488] sm:$0xff] }
  0x54   : > { %2888 = vst [vmem:[#allocation95_spill] sm:$0xff] %v1452_v36  ;;  %2889 = vst [vmem:[#allocation96_spill] sm:$0xff] %v1458_v13  ;;  %v1464_v30 = vld [vmem:[%s882_s12 + $0x490] sm:$0xff]  ;;  %v1470_v7 = vld [vmem:[%s882_s12 + $0x498] sm:$0xff] }
  0x55   : > { %2890 = vst [vmem:[#allocation97_spill] sm:$0xff] %v1461_v20  ;;  %2891 = vst [vmem:[#allocation98_spill] sm:$0xff] %v1464_v30  ;;  %v1473_v14 = vld [vmem:[%s882_s12 + $0x4a0] sm:$0xff]  ;;  %v1476_v24 = vld [vmem:[%s882_s12 + $0x4a8] sm:$0xff] }
  0x56   : > { %2892 = vst [vmem:[#allocation99_spill] sm:$0xff] %v1470_v7  ;;  %2893 = vst [vmem:[#allocation100_spill] sm:$0xff] %v1473_v14  ;;  %v1482_v19 = vld [vmem:[%s882_s12 + $0x4b0] sm:$0xff]  ;;  %v1485_v8 = vld [vmem:[%s882_s12 + $0x4b8] sm:$0xff] }
  0x57   : > { %2894 = vst [vmem:[#allocation101_spill] sm:$0xff] %v1476_v24  ;;  %2895 = vst [vmem:[#allocation102_spill] sm:$0xff] %v1482_v19  ;;  %v1488_v18 = vld [vmem:[%s882_s12 + $0x4c0] sm:$0xff]  ;;  %v1494_v13 = vld [vmem:[%s882_s12 + $0x4c8] sm:$0xff] }
  0x58   : > { %2896 = vst [vmem:[#allocation103_spill] sm:$0xff] %v1485_v8  ;;  %2897 = vst [vmem:[#allocation104_spill] sm:$0xff] %v1488_v18  ;;  %v1497_v42 = vld [vmem:[%s882_s12 + $0x4d0] sm:$0xff]  ;;  %v1500_v12 = vld [vmem:[%s882_s12 + $0x4d8] sm:$0xff] }
  0x59   : > { %2898 = vst [vmem:[#allocation105_spill] sm:$0xff] %v1494_v13  ;;  %2899 = vst [vmem:[#allocation106_spill] sm:$0xff] %v1497_v42  ;;  %v1506_v7 = vld [vmem:[%s882_s12 + $0x4e0] sm:$0xff]  ;;  %v1509_v26 = vld [vmem:[%s882_s12 + $0x4e8] sm:$0xff] }
  0x5a   : > { %2900 = vst [vmem:[#allocation107_spill] sm:$0xff] %v1500_v12  ;;  %2901 = vst [vmem:[#allocation108_spill] sm:$0xff] %v1506_v7  ;;  %v1512_v6 = vld [vmem:[%s882_s12 + $0x4f0] sm:$0xff]  ;;  %v1518_v19 = vld [vmem:[%s882_s12 + $0x4f8] sm:$0xff] }
  0x5b   : > { %2902 = vst [vmem:[#allocation109_spill] sm:$0xff] %v1509_v26  ;;  %2903 = vst [vmem:[#allocation110_spill] sm:$0xff] %v1512_v6  ;;  %v1521_v20 = vld [vmem:[%s882_s12 + $0x500] sm:$0xff]  ;;  %v1524_v36 = vld [vmem:[%s882_s12 + $0x508] sm:$0xff] }
  0x5c   : > { %2904 = vst [vmem:[#allocation111_spill] sm:$0xff] %v1518_v19  ;;  %2905 = vst [vmem:[#allocation112_spill] sm:$0xff] %v1521_v20  ;;  %v1530_v13 = vld [vmem:[%s882_s12 + $0x510] sm:$0xff]  ;;  %v1533_v14 = vld [vmem:[%s882_s12 + $0x518] sm:$0xff] }
  0x5d   : > { %2906 = vst [vmem:[#allocation113_spill] sm:$0xff] %v1524_v36  ;;  %2907 = vst [vmem:[#allocation114_spill] sm:$0xff] %v1530_v13  ;;  %v1536_v30 = vld [vmem:[%s882_s12 + $0x520] sm:$0xff]  ;;  %v1542_v7 = vld [vmem:[%s882_s12 + $0x528] sm:$0xff] }
  0x5e   : > { %2908 = vst [vmem:[#allocation115_spill] sm:$0xff] %v1533_v14  ;;  %2909 = vst [vmem:[#allocation116_spill] sm:$0xff] %v1536_v30  ;;  %v1545_v8 = vld [vmem:[%s882_s12 + $0x530] sm:$0xff]  ;;  %v1548_v24 = vld [vmem:[%s882_s12 + $0x538] sm:$0xff] }
  0x5f   : > { %2910 = vst [vmem:[#allocation117_spill] sm:$0xff] %v1542_v7  ;;  %2911 = vst [vmem:[#allocation118_spill] sm:$0xff] %v1545_v8  ;;  %v1554_v19 = vld [vmem:[%s882_s12 + $0x540] sm:$0xff]  ;;  %v1557_v42 = vld [vmem:[%s882_s12 + $0x548] sm:$0xff] }
  0x60   : > { %2912 = vst [vmem:[#allocation119_spill] sm:$0xff] %v1548_v24  ;;  %2913 = vst [vmem:[#allocation120_spill] sm:$0xff] %v1554_v19  ;;  %v1560_v18 = vld [vmem:[%s882_s12 + $0x550] sm:$0xff]  ;;  %v1566_v13 = vld [vmem:[%s882_s12 + $0x558] sm:$0xff] }
  0x61   : > { %2914 = vst [vmem:[#allocation121_spill] sm:$0xff] %v1557_v42  ;;  %2915 = vst [vmem:[#allocation122_spill] sm:$0xff] %v1560_v18  ;;  %v1569_v26 = vld [vmem:[%s882_s12 + $0x560] sm:$0xff]  ;;  %v1572_v12 = vld [vmem:[%s882_s12 + $0x568] sm:$0xff] }
  0x62   : > { %2916 = vst [vmem:[#allocation123_spill] sm:$0xff] %v1566_v13  ;;  %2917 = vst [vmem:[#allocation124_spill] sm:$0xff] %v1569_v26  ;;  %v1578_v7 = vld [vmem:[%s882_s12 + $0x570] sm:$0xff]  ;;  %v1581_v20 = vld [vmem:[%s882_s12 + $0x578] sm:$0xff] }
  0x63   : > { %2918 = vst [vmem:[#allocation125_spill] sm:$0xff] %v1572_v12  ;;  %2919 = vst [vmem:[#allocation126_spill] sm:$0xff] %v1578_v7  ;;  %v1584_v6 = vld [vmem:[%s882_s12 + $0x580] sm:$0xff]  ;;  %v1590_v19 = vld [vmem:[%s882_s12 + $0x588] sm:$0xff] }
  0x64   : > { %2920 = vst [vmem:[#allocation127_spill] sm:$0xff] %v1581_v20  ;;  %2921 = vst [vmem:[#allocation128_spill] sm:$0xff] %v1584_v6  ;;  %v1593_v14 = vld [vmem:[%s882_s12 + $0x590] sm:$0xff]  ;;  %v1596_v36 = vld [vmem:[%s882_s12 + $0x598] sm:$0xff] }
  0x65   : > { %2922 = vst [vmem:[#allocation129_spill] sm:$0xff] %v1590_v19  ;;  %2923 = vst [vmem:[#allocation130_spill] sm:$0xff] %v1593_v14  ;;  %v1602_v13 = vld [vmem:[%s882_s12 + $0x5a0] sm:$0xff]  ;;  %v1605_v8 = vld [vmem:[%s882_s12 + $0x5a8] sm:$0xff] }
  0x66   : > { %2924 = vst [vmem:[#allocation131_spill] sm:$0xff] %v1596_v36  ;;  %2925 = vst [vmem:[#allocation132_spill] sm:$0xff] %v1602_v13  ;;  %v1608_v30 = vld [vmem:[%s882_s12 + $0x5b0] sm:$0xff]  ;;  %v1614_v7 = vld [vmem:[%s882_s12 + $0x5b8] sm:$0xff] }
  0x67   : > { %2926 = vst [vmem:[#allocation133_spill] sm:$0xff] %v1605_v8  ;;  %2927 = vst [vmem:[#allocation134_spill] sm:$0xff] %v1608_v30  ;;  %v1617_v42 = vld [vmem:[%s882_s12 + $0x5c0] sm:$0xff]  ;;  %v1620_v24 = vld [vmem:[%s882_s12 + $0x5c8] sm:$0xff] }
  0x68   : > { %2928 = vst [vmem:[#allocation135_spill] sm:$0xff] %v1614_v7  ;;  %2929 = vst [vmem:[#allocation136_spill] sm:$0xff] %v1617_v42  ;;  %v1626_v26 = vld [vmem:[%s882_s12 + $0x5d0] sm:$0xff]  ;;  %v1629_v14 = vld [vmem:[%s882_s12 + $0x5d8] sm:$0xff] }
  0x69   : > { %2930 = vst [vmem:[#allocation137_spill] sm:$0xff] %v1620_v24  ;;  %2931 = vst [vmem:[#allocation138_spill] sm:$0xff] %v1626_v26  ;;  %v1632_v18 = vld [vmem:[%s882_s12 + $0x5e0] sm:$0xff]  ;;  %v1638_v8 = vld [vmem:[%s882_s12 + $0x5e8] sm:$0xff] }
  0x6a   : > { %2932 = vst [vmem:[#allocation139_spill] sm:$0xff] %v1629_v14  ;;  %2933 = vst [vmem:[#allocation140_spill] sm:$0xff] %v1632_v18  ;;  %v1641_v12 = vld [vmem:[%s882_s12 + $0x5f0] sm:$0xff]  ;;  %v1644_v30 = vld [vmem:[%s882_s12 + $0x5f8] sm:$0xff] }
  0x6b   : > { %2934 = vst [vmem:[#allocation141_spill] sm:$0xff] %v1638_v8  ;;  %2935 = vst [vmem:[#allocation142_spill] sm:$0xff] %v1641_v12  ;;  %v1650_v7 = vld [vmem:[%s882_s12 + $0x600] sm:$0xff]  ;;  %v1653_v6 = vld [vmem:[%s882_s12 + $0x608] sm:$0xff] }
  0x6c   : > { %2936 = vst [vmem:[#allocation143_spill] sm:$0xff] %v1644_v30  ;;  %2937 = vst [vmem:[#allocation144_spill] sm:$0xff] %v1650_v7  ;;  %v1656_v20 = vld [vmem:[%s882_s12 + $0x610] sm:$0xff]  ;;  %v1662_v26 = vld [vmem:[%s882_s12 + $0x618] sm:$0xff] }
  0x6d   : > { %2938 = vst [vmem:[#allocation145_spill] sm:$0xff] %v1653_v6  ;;  %2939 = vst [vmem:[#allocation146_spill] sm:$0xff] %v1656_v20  ;;  %v1665_v19 = vld [vmem:[%s882_s12 + $0x620] sm:$0xff]  ;;  %v1668_v36 = vld [vmem:[%s882_s12 + $0x628] sm:$0xff] }
  0x6e   : > { %2940 = vst [vmem:[#allocation147_spill] sm:$0xff] %v1662_v26  ;;  %2941 = vst [vmem:[#allocation148_spill] sm:$0xff] %v1665_v19  ;;  %v1674_v8 = vld [vmem:[%s882_s12 + $0x630] sm:$0xff]  ;;  %v1677_v42 = vld [vmem:[%s882_s12 + $0x638] sm:$0xff] }
  0x6f   : > { %2942 = vst [vmem:[#allocation149_spill] sm:$0xff] %v1668_v36  ;;  %2943 = vst [vmem:[#allocation150_spill] sm:$0xff] %v1674_v8  ;;  %v1680_v13 = vld [vmem:[%s882_s12 + $0x640] sm:$0xff]  ;;  %v1686_v7 = vld [vmem:[%s882_s12 + $0x648] sm:$0xff]  ;;  %v2956_v8 = vmax.f32 %v888_v1, 0.0  ;;  %v2960_v1 = vmax.f32 %v900_v5, 0.0 }
  0x70   : > { %2944 = vst [vmem:[#allocation151_spill] sm:$0xff] %v1677_v42  ;;  %2945 = vst [vmem:[#allocation152_spill] sm:$0xff] %v1680_v13  ;;  %v1689_v14 = vld [vmem:[%s882_s12 + $0x650] sm:$0xff]  ;;  %v1692_v24 = vld [vmem:[%s882_s12 + $0x658] sm:$0xff]  ;;  %v2955_v13 = vmax.f32 %v885_v0, 0.0  ;;  %v2959_v0 = vmax.f32 %v897_v4, 0.0 }
  0x71   : > { %2946 = vst [vmem:[#allocation153_spill] sm:$0xff] %v1689_v14  ;;  %2947 = vst [vmem:[#allocation154_spill] sm:$0xff] %v1692_v24  ;;  %v1698_v12 = vld [vmem:[%s882_s12 + $0x660] sm:$0xff]  ;;  %v1701_v19 = vld [vmem:[%s882_s12 + $0x668] sm:$0xff]  ;;  %v2963_v4 = vmax.f32 %v912_v11, 0.0  ;;  %v2964_v5 = vmax.f32 %v918_v15, 0.0 }
  0x72   : > { %2948 = vst [vmem:[#allocation155_spill] sm:$0xff] %v1698_v12  ;;  %2949 = vst [vmem:[#allocation156_spill] sm:$0xff] %v1701_v19  ;;  %v1704_v18 = vld [vmem:[%s882_s12 + $0x670] sm:$0xff]  ;;  %v1710_v6 = vld [vmem:[%s882_s12 + $0x678] sm:$0xff]  ;;  %v2969_v11 = vmax.f32 %v936_v23, 0.0  ;;  %v2971_v15 = vmax.f32 %v945_v28, 0.0 }
  0x73   : > { %2950 = vst [vmem:[#allocation157_spill] sm:$0xff] %v1704_v18  ;;  %2951 = vst [vmem:[#allocation158_spill] sm:$0xff] %v1710_v6  ;;  %v1713_v42 = vld [vmem:[%s882_s12 + $0x680] sm:$0xff]  ;;  %v1716_v30 = vld [vmem:[%s882_s12 + $0x688] sm:$0xff]  ;;  %v2958_v6 = vmax.f32 %v894_v3, 0.0  ;;  %v2962_v3 = vmax.f32 %v909_v10, 0.0 }
  0x74   : > { %2952 = vst [vmem:[#allocation159_spill] sm:$0xff] %v1713_v42  ;;  %2953 = vst [vmem:[#allocation160_spill] sm:$0xff] %v1716_v30  ;;  %v1729_v20 = vld [vmem:[%s882_s12 + $0x690] sm:$0xff]  ;;  %v1732_v26 = vld [vmem:[%s882_s12 + $0x698] sm:$0xff]  ;;  %v2968_v10 = vmax.f32 %v933_v22, 0.0  ;;  %v2975_v22 = vmax.f32 %v960_v35, 0.0 }
  0x75   : > { %v1735_v24 = vld [vmem:[%s882_s12 + $0x6a0] sm:$0xff]  ;;  %v1741_v18 = vld [vmem:[%s882_s12 + $0x6a8] sm:$0xff]  ;;  %v1744_v19 = vld [vmem:[%s882_s12 + $0x6b0] sm:$0xff]  ;;  %v2976_v23 = vmax.f32 %v966_v39, 0.0  ;;  %v2978_v28 = vmax.f32 %v972_v41, 0.0  ;;  %v2983_v35 = vmax.f32 %v993_v52, 0.0 }
  0x76   : > { %v1747_v12 = vld [vmem:[%s882_s12 + $0x6b8] sm:$0xff]  ;;  %v1753_v36 = vld [vmem:[%s882_s12 + $0x6c0] sm:$0xff]  ;;  %v1756_v30 = vld [vmem:[%s882_s12 + $0x6c8] sm:$0xff]  ;;  %v551_v42 = vmax.f32 %v1741_v18, 0.0  ;;  %v2984_v39 = vmax.f32 %v996_v53, 0.0  ;;  %v2986_v41 = vmax.f32 %v1005_v58, 0.0 }
  0x77   : > { %2954 = vst [vmem:[#allocation161_spill] sm:$0xff] %v1756_v30  ;;  %v553_v14 = vmax.f32 %v1747_v12, 0.0  ;;  %557 = vst.msk [vmem:[%s1726_s15] sm:$0xff] %vm556_vm0, %v2955_v13  ;;  %v2957_v30 = vmax.f32 %v891_v2, 0.0  ;;  %v2961_v2 = vmax.f32 %v906_v9, 0.0  ;;  %v2967_v9 = vmax.f32 %v930_v21, 0.0 }
  0x78   : > { %558 = vst.msk [vmem:[%s1726_s15 + $0x8] sm:$0xff] %vm556_vm0, %v2956_v8  ;;  %560 = vst.msk [vmem:[%s1726_s15 + $0x18] sm:$0xff] %vm556_vm0, %v2958_v6  ;;  %v2965_v6 = vmax.f32 %v921_v16, 0.0  ;;  %v2966_v8 = vmax.f32 %v924_v17, 0.0  ;;  %v2970_v13 = vmax.f32 %v942_v27, 0.0  ;;  %v2972_v16 = vmax.f32 %v948_v29, 0.0 }
  0x79   : > { %559 = vst.msk [vmem:[%s1726_s15 + $0x10] sm:$0xff] %vm556_vm0, %v2957_v30  ;;  %561 = vst.msk [vmem:[%s1726_s15 + $0x20] sm:$0xff] %vm556_vm0, %v2959_v0  ;;  %v2973_v17 = vmax.f32 %v954_v33, 0.0  ;;  %v2974_v21 = vmax.f32 %v957_v34, 0.0  ;;  %v2977_v27 = vmax.f32 %v969_v40, 0.0  ;;  %v2979_v29 = vmax.f32 %v978_v45, 0.0 }
  0x7a   : > { %562 = vst.msk [vmem:[%s1726_s15 + $0x28] sm:$0xff] %vm556_vm0, %v2960_v1  ;;  %563 = vst.msk [vmem:[%s1726_s15 + $0x30] sm:$0xff] %vm556_vm0, %v2961_v2  ;;  %v2980_v30 = vmax.f32 %v981_v46, 0.0  ;;  %v2981_v33 = vmax.f32 %v984_v47, 0.0  ;;  %v2982_v34 = vmax.f32 %v990_v51, 0.0  ;;  %v2985_v40 = vmax.f32 %v1002_v57, 0.0 }
  0x7b   : > { %564 = vst.msk [vmem:[%s1726_s15 + $0x38] sm:$0xff] %vm556_vm0, %v2962_v3  ;;  %565 = vst.msk [vmem:[%s1726_s15 + $0x40] sm:$0xff] %vm556_vm0, %v2963_v4  ;;  %v2987_v45 = vmax.f32 %v1008_v59, 0.0  ;;  %v2988_v46 = vmax.f32 %v1014_v63, 0.0  ;;  %v2989_v47 = vmax.f32 %v1017_v55, 0.0  ;;  %v2990_v51 = vmax.f32 %v1020_v56, 0.0 }
  0x7c   : > { %566 = vst.msk [vmem:[%s1726_s15 + $0x48] sm:$0xff] %vm556_vm0, %v2964_v5  ;;  %567 = vst.msk [vmem:[%s1726_s15 + $0x50] sm:$0xff] %vm556_vm0, %v2965_v6  ;;  %v2991_v52 = vmax.f32 %v1026_v49, 0.0  ;;  %v2992_v53 = vmax.f32 %v1029_v61, 0.0  ;;  %v2993_v55 = vmax.f32 %v1032_v62, 0.0  ;;  %v2994_v56 = vmax.f32 %v1038_v43, 0.0 }
  0x7d   : > { %568 = vst.msk [vmem:[%s1726_s15 + $0x58] sm:$0xff] %vm556_vm0, %v2966_v8  ;;  %569 = vst.msk [vmem:[%s1726_s15 + $0x60] sm:$0xff] %vm556_vm0, %v2967_v9  ;;  %v2995_v49 = vmax.f32 %v1041_v50, 0.0  ;;  %v2996_v57 = vmax.f32 %v1044_v60, 0.0  ;;  %v2997_v58 = vmax.f32 %v1050_v37, 0.0  ;;  %v2998_v43 = vmax.f32 %v1053_v44, 0.0 }
  0x7e   : > { %570 = vst.msk [vmem:[%s1726_s15 + $0x68] sm:$0xff] %vm556_vm0, %v2968_v10  ;;  %571 = vst.msk [vmem:[%s1726_s15 + $0x70] sm:$0xff] %vm556_vm0, %v2969_v11  ;;  %v2999_v50 = vmax.f32 %v1056_v54, 0.0  ;;  %v3000_v59 = vmax.f32 %v1062_v31, 0.0  ;;  %v3001_v37 = vmax.f32 %v1065_v38, 0.0  ;;  %v3002_v44 = vmax.f32 %v1068_v48, 0.0 }
  0x7f   : > { %572 = vst.msk [vmem:[%s1726_s15 + $0x78] sm:$0xff] %vm556_vm0, %v2970_v13  ;;  %573 = vst.msk [vmem:[%s1726_s15 + $0x80] sm:$0xff] %vm556_vm0, %v2971_v15  ;;  %v3003_v54 = vmax.f32 %v1074_v25, 0.0  ;;  %v3004_v31 = vmax.f32 %v1077_v32, 0.0  ;;  %v3005_v60 = vld [vmem:[#allocation2_spill] sm:$0xff]  ;;  %v3007_v61 = vld [vmem:[#allocation3_spill] sm:$0xff] }
  0x80   : > { %574 = vst.msk [vmem:[%s1726_s15 + $0x88] sm:$0xff] %vm556_vm0, %v2972_v16  ;;  %575 = vst.msk [vmem:[%s1726_s15 + $0x90] sm:$0xff] %vm556_vm0, %v2973_v17  ;;  %v3006_v38 = vmax.f32 %v3005_v60, 0.0  ;;  %v3008_v48 = vmax.f32 %v3007_v61, 0.0  ;;  %v3009_v62 = vld [vmem:[#allocation4_spill] sm:$0xff]  ;;  %v3011_v63 = vld [vmem:[#allocation5_spill] sm:$0xff] }
  0x81   : > { %576 = vst.msk [vmem:[%s1726_s15 + $0x98] sm:$0xff] %vm556_vm0, %v2974_v21  ;;  %577 = vst.msk [vmem:[%s1726_s15 + $0xa0] sm:$0xff] %vm556_vm0, %v2975_v22  ;;  %v3010_v25 = vmax.f32 %v3009_v62, 0.0  ;;  %v3012_v32 = vmax.f32 %v3011_v63, 0.0  ;;  %v3013_v0 = vld [vmem:[#allocation6_spill] sm:$0xff]  ;;  %v3015_v2 = vld [vmem:[#allocation7_spill] sm:$0xff] }
  0x82   : > { %578 = vst.msk [vmem:[%s1726_s15 + $0xa8] sm:$0xff] %vm556_vm0, %v2976_v23  ;;  %579 = vst.msk [vmem:[%s1726_s15 + $0xb0] sm:$0xff] %vm556_vm0, %v2977_v27  ;;  %v3014_v1 = vmax.f32 %v3013_v0, 0.0  ;;  %v3016_v3 = vmax.f32 %v3015_v2, 0.0  ;;  %v3017_v4 = vld [vmem:[#allocation8_spill] sm:$0xff]  ;;  %v3019_v6 = vld [vmem:[#allocation9_spill] sm:$0xff] }
  0x83   : > { %580 = vst.msk [vmem:[%s1726_s15 + $0xb8] sm:$0xff] %vm556_vm0, %v2978_v28  ;;  %581 = vst.msk [vmem:[%s1726_s15 + $0xc0] sm:$0xff] %vm556_vm0, %v2979_v29  ;;  %v3018_v5 = vmax.f32 %v3017_v4, 0.0  ;;  %v3020_v8 = vmax.f32 %v3019_v6, 0.0  ;;  %v3021_v9 = vld [vmem:[#allocation10_spill] sm:$0xff]  ;;  %v3023_v11 = vld [vmem:[#allocation11_spill] sm:$0xff] }
  0x84   : > { %582 = vst.msk [vmem:[%s1726_s15 + $0xc8] sm:$0xff] %vm556_vm0, %v2980_v30  ;;  %583 = vst.msk [vmem:[%s1726_s15 + $0xd0] sm:$0xff] %vm556_vm0, %v2981_v33  ;;  %v3022_v10 = vmax.f32 %v3021_v9, 0.0  ;;  %v3024_v13 = vmax.f32 %v3023_v11, 0.0  ;;  %v3025_v15 = vld [vmem:[#allocation12_spill] sm:$0xff]  ;;  %v3027_v17 = vld [vmem:[#allocation13_spill] sm:$0xff] }
  0x85   : > { %584 = vst.msk [vmem:[%s1726_s15 + $0xd8] sm:$0xff] %vm556_vm0, %v2982_v34  ;;  %585 = vst.msk [vmem:[%s1726_s15 + $0xe0] sm:$0xff] %vm556_vm0, %v2983_v35  ;;  %v3026_v16 = vmax.f32 %v3025_v15, 0.0  ;;  %v3028_v21 = vmax.f32 %v3027_v17, 0.0  ;;  %v3029_v22 = vld [vmem:[#allocation14_spill] sm:$0xff]  ;;  %v3031_v27 = vld [vmem:[#allocation15_spill] sm:$0xff] }
  0x86   : > { %586 = vst.msk [vmem:[%s1726_s15 + $0xe8] sm:$0xff] %vm556_vm0, %v2984_v39  ;;  %587 = vst.msk [vmem:[%s1726_s15 + $0xf0] sm:$0xff] %vm556_vm0, %v2985_v40  ;;  %v3030_v23 = vmax.f32 %v3029_v22, 0.0  ;;  %v3032_v28 = vmax.f32 %v3031_v27, 0.0  ;;  %v3033_v29 = vld [vmem:[#allocation16_spill] sm:$0xff]  ;;  %v3035_v33 = vld [vmem:[#allocation17_spill] sm:$0xff] }
  0x87   : > { %588 = vst.msk [vmem:[%s1726_s15 + $0xf8] sm:$0xff] %vm556_vm0, %v2986_v41  ;;  %589 = vst.msk [vmem:[%s1726_s15 + $0x100] sm:$0xff] %vm556_vm0, %v2987_v45  ;;  %v3034_v30 = vmax.f32 %v3033_v29, 0.0  ;;  %v3036_v34 = vmax.f32 %v3035_v33, 0.0  ;;  %v3037_v35 = vld [vmem:[#allocation18_spill] sm:$0xff]  ;;  %v3039_v40 = vld [vmem:[#allocation19_spill] sm:$0xff] }
  0x88   : > { %590 = vst.msk [vmem:[%s1726_s15 + $0x108] sm:$0xff] %vm556_vm0, %v2988_v46  ;;  %591 = vst.msk [vmem:[%s1726_s15 + $0x110] sm:$0xff] %vm556_vm0, %v2989_v47  ;;  %v3038_v39 = vmax.f32 %v3037_v35, 0.0  ;;  %v3040_v41 = vmax.f32 %v3039_v40, 0.0  ;;  %v3041_v45 = vld [vmem:[#allocation20_spill] sm:$0xff]  ;;  %v3043_v47 = vld [vmem:[#allocation21_spill] sm:$0xff] }
  0x89   : > { %592 = vst.msk [vmem:[%s1726_s15 + $0x118] sm:$0xff] %vm556_vm0, %v2990_v51  ;;  %593 = vst.msk [vmem:[%s1726_s15 + $0x120] sm:$0xff] %vm556_vm0, %v2991_v52  ;;  %v3042_v46 = vmax.f32 %v3041_v45, 0.0  ;;  %v3044_v51 = vmax.f32 %v3043_v47, 0.0  ;;  %v3045_v52 = vld [vmem:[#allocation22_spill] sm:$0xff]  ;;  %v3059_v60 = vld [vmem:[#allocation29_spill] sm:$0xff] }
  0x8a   : > { %594 = vst.msk [vmem:[%s1726_s15 + $0x128] sm:$0xff] %vm556_vm0, %v2992_v53  ;;  %595 = vst.msk [vmem:[%s1726_s15 + $0x130] sm:$0xff] %vm556_vm0, %v2993_v55  ;;  %v3046_v53 = vmax.f32 %v3045_v52, 0.0  ;;  %v3047_v55 = vld [vmem:[#allocation23_spill] sm:$0xff]  ;;  %v3061_v61 = vld [vmem:[#allocation30_spill] sm:$0xff] }
  0x8b   : > { %596 = vst.msk [vmem:[%s1726_s15 + $0x138] sm:$0xff] %vm556_vm0, %v2994_v56  ;;  %597 = vst.msk [vmem:[%s1726_s15 + $0x140] sm:$0xff] %vm556_vm0, %v2995_v49  ;;  %v3048_v56 = vmax.f32 %v3047_v55, 0.0  ;;  %v3049_v49 = vld [vmem:[#allocation24_spill] sm:$0xff]  ;;  %v3063_v62 = vld [vmem:[#allocation31_spill] sm:$0xff] }
  0x8c   : > { %598 = vst.msk [vmem:[%s1726_s15 + $0x148] sm:$0xff] %vm556_vm0, %v2996_v57  ;;  %599 = vst.msk [vmem:[%s1726_s15 + $0x150] sm:$0xff] %vm556_vm0, %v2997_v58  ;;  %v3050_v57 = vmax.f32 %v3049_v49, 0.0  ;;  %v3051_v58 = vld [vmem:[#allocation25_spill] sm:$0xff]  ;;  %v3065_v63 = vld [vmem:[#allocation32_spill] sm:$0xff] }
  0x8d   : > { %600 = vst.msk [vmem:[%s1726_s15 + $0x158] sm:$0xff] %vm556_vm0, %v2998_v43  ;;  %601 = vst.msk [vmem:[%s1726_s15 + $0x160] sm:$0xff] %vm556_vm0, %v2999_v50  ;;  %v3052_v43 = vmax.f32 %v3051_v58, 0.0  ;;  %v3053_v50 = vld [vmem:[#allocation26_spill] sm:$0xff]  ;;  %v3067_v0 = vld [vmem:[#allocation33_spill] sm:$0xff] }
  0x8e   : > { %602 = vst.msk [vmem:[%s1726_s15 + $0x168] sm:$0xff] %vm556_vm0, %v3000_v59  ;;  %603 = vst.msk [vmem:[%s1726_s15 + $0x170] sm:$0xff] %vm556_vm0, %v3001_v37  ;;  %v3054_v59 = vmax.f32 %v3053_v50, 0.0  ;;  %v3055_v37 = vld [vmem:[#allocation27_spill] sm:$0xff]  ;;  %v3069_v2 = vld [vmem:[#allocation34_spill] sm:$0xff] }
  0x8f   : > { %604 = vst.msk [vmem:[%s1726_s15 + $0x178] sm:$0xff] %vm556_vm0, %v3002_v44  ;;  %605 = vst.msk [vmem:[%s1726_s15 + $0x180] sm:$0xff] %vm556_vm0, %v3003_v54  ;;  %v3056_v44 = vmax.f32 %v3055_v37, 0.0  ;;  %v3057_v54 = vld [vmem:[#allocation28_spill] sm:$0xff]  ;;  %v3071_v4 = vld [vmem:[#allocation35_spill] sm:$0xff] }
  0x90   : > { %606 = vst.msk [vmem:[%s1726_s15 + $0x188] sm:$0xff] %vm556_vm0, %v3004_v31  ;;  %607 = vst.msk [vmem:[%s1726_s15 + $0x190] sm:$0xff] %vm556_vm0, %v3006_v38  ;;  %v3058_v31 = vmax.f32 %v3057_v54, 0.0  ;;  %v3060_v38 = vmax.f32 %v3059_v60, 0.0  ;;  %v3073_v6 = vld [vmem:[#allocation36_spill] sm:$0xff]  ;;  %v3075_v9 = vld [vmem:[#allocation37_spill] sm:$0xff] }
  0x91   : > { %608 = vst.msk [vmem:[%s1726_s15 + $0x198] sm:$0xff] %vm556_vm0, %v3008_v48  ;;  %609 = vst.msk [vmem:[%s1726_s15 + $0x1a0] sm:$0xff] %vm556_vm0, %v3010_v25  ;;  %v3062_v48 = vmax.f32 %v3061_v61, 0.0  ;;  %v3064_v25 = vmax.f32 %v3063_v62, 0.0  ;;  %v3077_v11 = vld [vmem:[#allocation38_spill] sm:$0xff]  ;;  %v3079_v15 = vld [vmem:[#allocation39_spill] sm:$0xff] }
  0x92   : > { %610 = vst.msk [vmem:[%s1726_s15 + $0x1a8] sm:$0xff] %vm556_vm0, %v3012_v32  ;;  %611 = vst.msk [vmem:[%s1726_s15 + $0x1b0] sm:$0xff] %vm556_vm0, %v3014_v1  ;;  %v3066_v32 = vmax.f32 %v3065_v63, 0.0  ;;  %v3068_v1 = vmax.f32 %v3067_v0, 0.0  ;;  %v3081_v17 = vld [vmem:[#allocation40_spill] sm:$0xff]  ;;  %v3083_v22 = vld [vmem:[#allocation41_spill] sm:$0xff] }
  0x93   : > { %612 = vst.msk [vmem:[%s1726_s15 + $0x1b8] sm:$0xff] %vm556_vm0, %v3016_v3  ;;  %613 = vst.msk [vmem:[%s1726_s15 + $0x1c0] sm:$0xff] %vm556_vm0, %v3018_v5  ;;  %v3070_v3 = vmax.f32 %v3069_v2, 0.0  ;;  %v3072_v5 = vmax.f32 %v3071_v4, 0.0  ;;  %v3085_v27 = vld [vmem:[#allocation42_spill] sm:$0xff]  ;;  %v3087_v29 = vld [vmem:[#allocation43_spill] sm:$0xff] }
  0x94   : > { %614 = vst.msk [vmem:[%s1726_s15 + $0x1c8] sm:$0xff] %vm556_vm0, %v3020_v8  ;;  %615 = vst.msk [vmem:[%s1726_s15 + $0x1d0] sm:$0xff] %vm556_vm0, %v3022_v10  ;;  %v3074_v8 = vmax.f32 %v3073_v6, 0.0  ;;  %v3076_v10 = vmax.f32 %v3075_v9, 0.0  ;;  %v3089_v33 = vld [vmem:[#allocation44_spill] sm:$0xff]  ;;  %v3091_v35 = vld [vmem:[#allocation45_spill] sm:$0xff] }
  0x95   : > { %616 = vst.msk [vmem:[%s1726_s15 + $0x1d8] sm:$0xff] %vm556_vm0, %v3024_v13  ;;  %617 = vst.msk [vmem:[%s1726_s15 + $0x1e0] sm:$0xff] %vm556_vm0, %v3026_v16  ;;  %v3078_v13 = vmax.f32 %v3077_v11, 0.0  ;;  %v3080_v16 = vmax.f32 %v3079_v15, 0.0  ;;  %v3093_v40 = vld [vmem:[#allocation46_spill] sm:$0xff]  ;;  %v3095_v45 = vld [vmem:[#allocation47_spill] sm:$0xff] }
  0x96   : > { %618 = vst.msk [vmem:[%s1726_s15 + $0x1e8] sm:$0xff] %vm556_vm0, %v3028_v21  ;;  %619 = vst.msk [vmem:[%s1726_s15 + $0x1f0] sm:$0xff] %vm556_vm0, %v3030_v23  ;;  %v3082_v21 = vmax.f32 %v3081_v17, 0.0  ;;  %v3084_v23 = vmax.f32 %v3083_v22, 0.0  ;;  %v3097_v47 = vld [vmem:[#allocation48_spill] sm:$0xff]  ;;  %v3099_v52 = vld [vmem:[#allocation49_spill] sm:$0xff] }
  0x97   : > { %620 = vst.msk [vmem:[%s1726_s15 + $0x1f8] sm:$0xff] %vm556_vm0, %v3032_v28  ;;  %621 = vst.msk [vmem:[%s1726_s15 + $0x200] sm:$0xff] %vm556_vm0, %v3034_v30  ;;  %v3086_v28 = vmax.f32 %v3085_v27, 0.0  ;;  %v3088_v30 = vmax.f32 %v3087_v29, 0.0  ;;  %v3101_v55 = vld [vmem:[#allocation50_spill] sm:$0xff]  ;;  %v3103_v49 = vld [vmem:[#allocation51_spill] sm:$0xff] }
  0x98   : > { %622 = vst.msk [vmem:[%s1726_s15 + $0x208] sm:$0xff] %vm556_vm0, %v3036_v34  ;;  %623 = vst.msk [vmem:[%s1726_s15 + $0x210] sm:$0xff] %vm556_vm0, %v3038_v39  ;;  %v3090_v34 = vmax.f32 %v3089_v33, 0.0  ;;  %v3092_v39 = vmax.f32 %v3091_v35, 0.0  ;;  %v3105_v58 = vld [vmem:[#allocation52_spill] sm:$0xff]  ;;  %v3107_v50 = vld [vmem:[#allocation53_spill] sm:$0xff] }
  0x99   : > { %624 = vst.msk [vmem:[%s1726_s15 + $0x218] sm:$0xff] %vm556_vm0, %v3040_v41  ;;  %625 = vst.msk [vmem:[%s1726_s15 + $0x220] sm:$0xff] %vm556_vm0, %v3042_v46  ;;  %v3094_v41 = vmax.f32 %v3093_v40, 0.0  ;;  %v3096_v46 = vmax.f32 %v3095_v45, 0.0  ;;  %v3109_v37 = vld [vmem:[#allocation54_spill] sm:$0xff]  ;;  %v3111_v54 = vld [vmem:[#allocation55_spill] sm:$0xff] }
  0x9a   : > { %626 = vst.msk [vmem:[%s1726_s15 + $0x228] sm:$0xff] %vm556_vm0, %v3044_v51  ;;  %627 = vst.msk [vmem:[%s1726_s15 + $0x230] sm:$0xff] %vm556_vm0, %v3046_v53  ;;  %v3098_v51 = vmax.f32 %v3097_v47, 0.0  ;;  %v3100_v53 = vmax.f32 %v3099_v52, 0.0  ;;  %v3113_v60 = vld [vmem:[#allocation56_spill] sm:$0xff]  ;;  %v3115_v61 = vld [vmem:[#allocation57_spill] sm:$0xff] }
  0x9b   : > { %628 = vst.msk [vmem:[%s1726_s15 + $0x238] sm:$0xff] %vm556_vm0, %v3048_v56  ;;  %629 = vst.msk [vmem:[%s1726_s15 + $0x240] sm:$0xff] %vm556_vm0, %v3050_v57  ;;  %v3102_v56 = vmax.f32 %v3101_v55, 0.0  ;;  %v3104_v57 = vmax.f32 %v3103_v49, 0.0  ;;  %v3117_v62 = vld [vmem:[#allocation58_spill] sm:$0xff]  ;;  %v3119_v63 = vld [vmem:[#allocation59_spill] sm:$0xff] }
  0x9c   : > { %630 = vst.msk [vmem:[%s1726_s15 + $0x248] sm:$0xff] %vm556_vm0, %v3052_v43  ;;  %631 = vst.msk [vmem:[%s1726_s15 + $0x250] sm:$0xff] %vm556_vm0, %v3054_v59  ;;  %v3106_v43 = vmax.f32 %v3105_v58, 0.0  ;;  %v3108_v59 = vmax.f32 %v3107_v50, 0.0  ;;  %v3121_v0 = vld [vmem:[#allocation60_spill] sm:$0xff]  ;;  %v3123_v2 = vld [vmem:[#allocation61_spill] sm:$0xff] }
  0x9d   : > { %632 = vst.msk [vmem:[%s1726_s15 + $0x258] sm:$0xff] %vm556_vm0, %v3056_v44  ;;  %633 = vst.msk [vmem:[%s1726_s15 + $0x260] sm:$0xff] %vm556_vm0, %v3058_v31  ;;  %v3110_v44 = vmax.f32 %v3109_v37, 0.0  ;;  %v3112_v31 = vmax.f32 %v3111_v54, 0.0  ;;  %v3125_v4 = vld [vmem:[#allocation62_spill] sm:$0xff]  ;;  %v3127_v6 = vld [vmem:[#allocation63_spill] sm:$0xff] }
  0x9e   : > { %634 = vst.msk [vmem:[%s1726_s15 + $0x268] sm:$0xff] %vm556_vm0, %v3060_v38  ;;  %635 = vst.msk [vmem:[%s1726_s15 + $0x270] sm:$0xff] %vm556_vm0, %v3062_v48  ;;  %v3114_v38 = vmax.f32 %v3113_v60, 0.0  ;;  %v3116_v48 = vmax.f32 %v3115_v61, 0.0  ;;  %v3129_v9 = vld [vmem:[#allocation64_spill] sm:$0xff]  ;;  %v3131_v11 = vld [vmem:[#allocation65_spill] sm:$0xff] }
  0x9f   : > { %636 = vst.msk [vmem:[%s1726_s15 + $0x278] sm:$0xff] %vm556_vm0, %v3064_v25  ;;  %637 = vst.msk [vmem:[%s1726_s15 + $0x280] sm:$0xff] %vm556_vm0, %v3066_v32  ;;  %v3118_v25 = vmax.f32 %v3117_v62, 0.0  ;;  %v3120_v32 = vmax.f32 %v3119_v63, 0.0  ;;  %v3133_v15 = vld [vmem:[#allocation66_spill] sm:$0xff]  ;;  %v3135_v17 = vld [vmem:[#allocation67_spill] sm:$0xff] }
  0xa0   : > { %638 = vst.msk [vmem:[%s1726_s15 + $0x288] sm:$0xff] %vm556_vm0, %v3068_v1  ;;  %639 = vst.msk [vmem:[%s1726_s15 + $0x290] sm:$0xff] %vm556_vm0, %v3070_v3  ;;  %v3122_v1 = vmax.f32 %v3121_v0, 0.0  ;;  %v3124_v3 = vmax.f32 %v3123_v2, 0.0  ;;  %v3137_v22 = vld [vmem:[#allocation68_spill] sm:$0xff]  ;;  %v3139_v27 = vld [vmem:[#allocation69_spill] sm:$0xff] }
  0xa1   : > { %640 = vst.msk [vmem:[%s1726_s15 + $0x298] sm:$0xff] %vm556_vm0, %v3072_v5  ;;  %641 = vst.msk [vmem:[%s1726_s15 + $0x2a0] sm:$0xff] %vm556_vm0, %v3074_v8  ;;  %v3126_v5 = vmax.f32 %v3125_v4, 0.0  ;;  %v3128_v8 = vmax.f32 %v3127_v6, 0.0  ;;  %v3141_v29 = vld [vmem:[#allocation70_spill] sm:$0xff]  ;;  %v3143_v33 = vld [vmem:[#allocation71_spill] sm:$0xff] }
  0xa2   : > { %642 = vst.msk [vmem:[%s1726_s15 + $0x2a8] sm:$0xff] %vm556_vm0, %v3076_v10  ;;  %643 = vst.msk [vmem:[%s1726_s15 + $0x2b0] sm:$0xff] %vm556_vm0, %v3078_v13  ;;  %v3130_v10 = vmax.f32 %v3129_v9, 0.0  ;;  %v3132_v13 = vmax.f32 %v3131_v11, 0.0  ;;  %v3145_v35 = vld [vmem:[#allocation72_spill] sm:$0xff]  ;;  %v3147_v40 = vld [vmem:[#allocation73_spill] sm:$0xff] }
  0xa3   : > { %644 = vst.msk [vmem:[%s1726_s15 + $0x2b8] sm:$0xff] %vm556_vm0, %v3080_v16  ;;  %645 = vst.msk [vmem:[%s1726_s15 + $0x2c0] sm:$0xff] %vm556_vm0, %v3082_v21  ;;  %v3134_v16 = vmax.f32 %v3133_v15, 0.0  ;;  %v3136_v21 = vmax.f32 %v3135_v17, 0.0  ;;  %v3149_v45 = vld [vmem:[#allocation74_spill] sm:$0xff]  ;;  %v3151_v47 = vld [vmem:[#allocation75_spill] sm:$0xff] }
  0xa4   : > { %646 = vst.msk [vmem:[%s1726_s15 + $0x2c8] sm:$0xff] %vm556_vm0, %v3084_v23  ;;  %647 = vst.msk [vmem:[%s1726_s15 + $0x2d0] sm:$0xff] %vm556_vm0, %v3086_v28  ;;  %v3138_v23 = vmax.f32 %v3137_v22, 0.0  ;;  %v3140_v28 = vmax.f32 %v3139_v27, 0.0  ;;  %v3153_v52 = vld [vmem:[#allocation76_spill] sm:$0xff]  ;;  %v3155_v55 = vld [vmem:[#allocation77_spill] sm:$0xff] }
  0xa5   : > { %648 = vst.msk [vmem:[%s1726_s15 + $0x2d8] sm:$0xff] %vm556_vm0, %v3088_v30  ;;  %649 = vst.msk [vmem:[%s1726_s15 + $0x2e0] sm:$0xff] %vm556_vm0, %v3090_v34  ;;  %v3142_v30 = vmax.f32 %v3141_v29, 0.0  ;;  %v3144_v34 = vmax.f32 %v3143_v33, 0.0  ;;  %v3157_v49 = vld [vmem:[#allocation78_spill] sm:$0xff]  ;;  %v3159_v58 = vld [vmem:[#allocation79_spill] sm:$0xff] }
  0xa6   : > { %650 = vst.msk [vmem:[%s1726_s15 + $0x2e8] sm:$0xff] %vm556_vm0, %v3092_v39  ;;  %651 = vst.msk [vmem:[%s1726_s15 + $0x2f0] sm:$0xff] %vm556_vm0, %v3094_v41  ;;  %v3146_v39 = vmax.f32 %v3145_v35, 0.0  ;;  %v3148_v41 = vmax.f32 %v3147_v40, 0.0  ;;  %v3161_v50 = vld [vmem:[#allocation80_spill] sm:$0xff]  ;;  %v3163_v37 = vld [vmem:[#allocation81_spill] sm:$0xff] }
  0xa7   : > { %652 = vst.msk [vmem:[%s1726_s15 + $0x2f8] sm:$0xff] %vm556_vm0, %v3096_v46  ;;  %653 = vst.msk [vmem:[%s1726_s15 + $0x300] sm:$0xff] %vm556_vm0, %v3098_v51  ;;  %v3150_v46 = vmax.f32 %v3149_v45, 0.0  ;;  %v3152_v51 = vmax.f32 %v3151_v47, 0.0  ;;  %v3165_v54 = vld [vmem:[#allocation82_spill] sm:$0xff]  ;;  %v3167_v60 = vld [vmem:[#allocation83_spill] sm:$0xff] }
  0xa8   : > { %654 = vst.msk [vmem:[%s1726_s15 + $0x308] sm:$0xff] %vm556_vm0, %v3100_v53  ;;  %655 = vst.msk [vmem:[%s1726_s15 + $0x310] sm:$0xff] %vm556_vm0, %v3102_v56  ;;  %v3154_v53 = vmax.f32 %v3153_v52, 0.0  ;;  %v3156_v56 = vmax.f32 %v3155_v55, 0.0  ;;  %v3169_v61 = vld [vmem:[#allocation84_spill] sm:$0xff]  ;;  %v3171_v62 = vld [vmem:[#allocation85_spill] sm:$0xff] }
  0xa9   : > { %656 = vst.msk [vmem:[%s1726_s15 + $0x318] sm:$0xff] %vm556_vm0, %v3104_v57  ;;  %657 = vst.msk [vmem:[%s1726_s15 + $0x320] sm:$0xff] %vm556_vm0, %v3106_v43  ;;  %v3158_v57 = vmax.f32 %v3157_v49, 0.0  ;;  %v3160_v43 = vmax.f32 %v3159_v58, 0.0  ;;  %v3173_v63 = vld [vmem:[#allocation86_spill] sm:$0xff]  ;;  %v3175_v0 = vld [vmem:[#allocation87_spill] sm:$0xff] }
  0xaa   : > { %658 = vst.msk [vmem:[%s1726_s15 + $0x328] sm:$0xff] %vm556_vm0, %v3108_v59  ;;  %659 = vst.msk [vmem:[%s1726_s15 + $0x330] sm:$0xff] %vm556_vm0, %v3110_v44  ;;  %v3162_v59 = vmax.f32 %v3161_v50, 0.0  ;;  %v3164_v44 = vmax.f32 %v3163_v37, 0.0  ;;  %v3177_v2 = vld [vmem:[#allocation88_spill] sm:$0xff]  ;;  %v3179_v4 = vld [vmem:[#allocation89_spill] sm:$0xff] }
  0xab   : > { %660 = vst.msk [vmem:[%s1726_s15 + $0x338] sm:$0xff] %vm556_vm0, %v3112_v31  ;;  %661 = vst.msk [vmem:[%s1726_s15 + $0x340] sm:$0xff] %vm556_vm0, %v3114_v38  ;;  %v3166_v31 = vmax.f32 %v3165_v54, 0.0  ;;  %v3168_v38 = vmax.f32 %v3167_v60, 0.0  ;;  %v3181_v6 = vld [vmem:[#allocation90_spill] sm:$0xff]  ;;  %v3183_v9 = vld [vmem:[#allocation91_spill] sm:$0xff] }
  0xac   : > { %662 = vst.msk [vmem:[%s1726_s15 + $0x348] sm:$0xff] %vm556_vm0, %v3116_v48  ;;  %663 = vst.msk [vmem:[%s1726_s15 + $0x350] sm:$0xff] %vm556_vm0, %v3118_v25  ;;  %v3170_v48 = vmax.f32 %v3169_v61, 0.0  ;;  %v3172_v25 = vmax.f32 %v3171_v62, 0.0  ;;  %v3185_v11 = vld [vmem:[#allocation92_spill] sm:$0xff]  ;;  %v3187_v15 = vld [vmem:[#allocation93_spill] sm:$0xff] }
  0xad   : > { %664 = vst.msk [vmem:[%s1726_s15 + $0x358] sm:$0xff] %vm556_vm0, %v3120_v32  ;;  %665 = vst.msk [vmem:[%s1726_s15 + $0x360] sm:$0xff] %vm556_vm0, %v3122_v1  ;;  %v3174_v32 = vmax.f32 %v3173_v63, 0.0  ;;  %v3176_v1 = vmax.f32 %v3175_v0, 0.0  ;;  %v3189_v17 = vld [vmem:[#allocation94_spill] sm:$0xff]  ;;  %v3191_v22 = vld [vmem:[#allocation95_spill] sm:$0xff] }
  0xae   : > { %666 = vst.msk [vmem:[%s1726_s15 + $0x368] sm:$0xff] %vm556_vm0, %v3124_v3  ;;  %667 = vst.msk [vmem:[%s1726_s15 + $0x370] sm:$0xff] %vm556_vm0, %v3126_v5  ;;  %v3178_v3 = vmax.f32 %v3177_v2, 0.0  ;;  %v3180_v5 = vmax.f32 %v3179_v4, 0.0  ;;  %v3193_v27 = vld [vmem:[#allocation96_spill] sm:$0xff]  ;;  %v3195_v29 = vld [vmem:[#allocation97_spill] sm:$0xff] }
  0xaf   : > { %668 = vst.msk [vmem:[%s1726_s15 + $0x378] sm:$0xff] %vm556_vm0, %v3128_v8  ;;  %669 = vst.msk [vmem:[%s1726_s15 + $0x380] sm:$0xff] %vm556_vm0, %v3130_v10  ;;  %v3182_v8 = vmax.f32 %v3181_v6, 0.0  ;;  %v3184_v10 = vmax.f32 %v3183_v9, 0.0  ;;  %v3197_v33 = vld [vmem:[#allocation98_spill] sm:$0xff]  ;;  %v3199_v35 = vld [vmem:[#allocation99_spill] sm:$0xff] }
  0xb0   : > { %670 = vst.msk [vmem:[%s1726_s15 + $0x388] sm:$0xff] %vm556_vm0, %v3132_v13  ;;  %671 = vst.msk [vmem:[%s1726_s15 + $0x390] sm:$0xff] %vm556_vm0, %v3134_v16  ;;  %v3186_v13 = vmax.f32 %v3185_v11, 0.0  ;;  %v3188_v16 = vmax.f32 %v3187_v15, 0.0  ;;  %v3201_v40 = vld [vmem:[#allocation100_spill] sm:$0xff]  ;;  %v3203_v45 = vld [vmem:[#allocation101_spill] sm:$0xff] }
  0xb1   : > { %672 = vst.msk [vmem:[%s1726_s15 + $0x398] sm:$0xff] %vm556_vm0, %v3136_v21  ;;  %673 = vst.msk [vmem:[%s1726_s15 + $0x3a0] sm:$0xff] %vm556_vm0, %v3138_v23  ;;  %v3190_v21 = vmax.f32 %v3189_v17, 0.0  ;;  %v3192_v23 = vmax.f32 %v3191_v22, 0.0  ;;  %v3205_v47 = vld [vmem:[#allocation102_spill] sm:$0xff]  ;;  %v3207_v52 = vld [vmem:[#allocation103_spill] sm:$0xff] }
  0xb2   : > { %674 = vst.msk [vmem:[%s1726_s15 + $0x3a8] sm:$0xff] %vm556_vm0, %v3140_v28  ;;  %675 = vst.msk [vmem:[%s1726_s15 + $0x3b0] sm:$0xff] %vm556_vm0, %v3142_v30  ;;  %v3194_v28 = vmax.f32 %v3193_v27, 0.0  ;;  %v3196_v30 = vmax.f32 %v3195_v29, 0.0  ;;  %v3209_v55 = vld [vmem:[#allocation104_spill] sm:$0xff]  ;;  %v3211_v49 = vld [vmem:[#allocation105_spill] sm:$0xff] }
  0xb3   : > { %676 = vst.msk [vmem:[%s1726_s15 + $0x3b8] sm:$0xff] %vm556_vm0, %v3144_v34  ;;  %677 = vst.msk [vmem:[%s1726_s15 + $0x3c0] sm:$0xff] %vm556_vm0, %v3146_v39  ;;  %v3198_v34 = vmax.f32 %v3197_v33, 0.0  ;;  %v3200_v39 = vmax.f32 %v3199_v35, 0.0  ;;  %v3213_v58 = vld [vmem:[#allocation106_spill] sm:$0xff]  ;;  %v3215_v50 = vld [vmem:[#allocation107_spill] sm:$0xff] }
  0xb4   : > { %678 = vst.msk [vmem:[%s1726_s15 + $0x3c8] sm:$0xff] %vm556_vm0, %v3148_v41  ;;  %679 = vst.msk [vmem:[%s1726_s15 + $0x3d0] sm:$0xff] %vm556_vm0, %v3150_v46  ;;  %v3202_v41 = vmax.f32 %v3201_v40, 0.0  ;;  %v3204_v46 = vmax.f32 %v3203_v45, 0.0  ;;  %v3217_v37 = vld [vmem:[#allocation108_spill] sm:$0xff]  ;;  %v3219_v54 = vld [vmem:[#allocation109_spill] sm:$0xff] }
  0xb5   : > { %680 = vst.msk [vmem:[%s1726_s15 + $0x3d8] sm:$0xff] %vm556_vm0, %v3152_v51  ;;  %681 = vst.msk [vmem:[%s1726_s15 + $0x3e0] sm:$0xff] %vm556_vm0, %v3154_v53  ;;  %v3206_v51 = vmax.f32 %v3205_v47, 0.0  ;;  %v3208_v53 = vmax.f32 %v3207_v52, 0.0  ;;  %v3221_v60 = vld [vmem:[#allocation110_spill] sm:$0xff]  ;;  %v3223_v61 = vld [vmem:[#allocation111_spill] sm:$0xff] }
  0xb6   : > { %682 = vst.msk [vmem:[%s1726_s15 + $0x3e8] sm:$0xff] %vm556_vm0, %v3156_v56  ;;  %683 = vst.msk [vmem:[%s1726_s15 + $0x3f0] sm:$0xff] %vm556_vm0, %v3158_v57  ;;  %v3210_v56 = vmax.f32 %v3209_v55, 0.0  ;;  %v3212_v57 = vmax.f32 %v3211_v49, 0.0  ;;  %v3225_v62 = vld [vmem:[#allocation112_spill] sm:$0xff]  ;;  %v3227_v63 = vld [vmem:[#allocation113_spill] sm:$0xff] }
  0xb7   : > { %684 = vst.msk [vmem:[%s1726_s15 + $0x3f8] sm:$0xff] %vm556_vm0, %v3160_v43  ;;  %685 = vst.msk [vmem:[%s1726_s15 + $0x400] sm:$0xff] %vm556_vm0, %v3162_v59  ;;  %v3214_v43 = vmax.f32 %v3213_v58, 0.0  ;;  %v3216_v59 = vmax.f32 %v3215_v50, 0.0  ;;  %v3229_v0 = vld [vmem:[#allocation114_spill] sm:$0xff]  ;;  %v3231_v2 = vld [vmem:[#allocation115_spill] sm:$0xff] }
  0xb8   : > { %686 = vst.msk [vmem:[%s1726_s15 + $0x408] sm:$0xff] %vm556_vm0, %v3164_v44  ;;  %687 = vst.msk [vmem:[%s1726_s15 + $0x410] sm:$0xff] %vm556_vm0, %v3166_v31  ;;  %v3218_v44 = vmax.f32 %v3217_v37, 0.0  ;;  %v3220_v31 = vmax.f32 %v3219_v54, 0.0  ;;  %v3233_v4 = vld [vmem:[#allocation116_spill] sm:$0xff]  ;;  %v3235_v6 = vld [vmem:[#allocation117_spill] sm:$0xff] }
  0xb9   : > { %688 = vst.msk [vmem:[%s1726_s15 + $0x418] sm:$0xff] %vm556_vm0, %v3168_v38  ;;  %689 = vst.msk [vmem:[%s1726_s15 + $0x420] sm:$0xff] %vm556_vm0, %v3170_v48  ;;  %v3222_v38 = vmax.f32 %v3221_v60, 0.0  ;;  %v3224_v48 = vmax.f32 %v3223_v61, 0.0  ;;  %v3237_v9 = vld [vmem:[#allocation118_spill] sm:$0xff]  ;;  %v3239_v11 = vld [vmem:[#allocation119_spill] sm:$0xff] }
  0xba   : > { %690 = vst.msk [vmem:[%s1726_s15 + $0x428] sm:$0xff] %vm556_vm0, %v3172_v25  ;;  %691 = vst.msk [vmem:[%s1726_s15 + $0x430] sm:$0xff] %vm556_vm0, %v3174_v32  ;;  %v3226_v25 = vmax.f32 %v3225_v62, 0.0  ;;  %v3228_v32 = vmax.f32 %v3227_v63, 0.0  ;;  %v3241_v15 = vld [vmem:[#allocation120_spill] sm:$0xff]  ;;  %v3243_v17 = vld [vmem:[#allocation121_spill] sm:$0xff] }
  0xbb   : > { %692 = vst.msk [vmem:[%s1726_s15 + $0x438] sm:$0xff] %vm556_vm0, %v3176_v1  ;;  %693 = vst.msk [vmem:[%s1726_s15 + $0x440] sm:$0xff] %vm556_vm0, %v3178_v3  ;;  %v3230_v1 = vmax.f32 %v3229_v0, 0.0  ;;  %v3232_v3 = vmax.f32 %v3231_v2, 0.0  ;;  %v3245_v22 = vld [vmem:[#allocation122_spill] sm:$0xff]  ;;  %v3247_v27 = vld [vmem:[#allocation123_spill] sm:$0xff] }
  0xbc   : > { %694 = vst.msk [vmem:[%s1726_s15 + $0x448] sm:$0xff] %vm556_vm0, %v3180_v5  ;;  %695 = vst.msk [vmem:[%s1726_s15 + $0x450] sm:$0xff] %vm556_vm0, %v3182_v8  ;;  %v3234_v5 = vmax.f32 %v3233_v4, 0.0  ;;  %v3236_v8 = vmax.f32 %v3235_v6, 0.0  ;;  %v3249_v29 = vld [vmem:[#allocation124_spill] sm:$0xff]  ;;  %v3251_v33 = vld [vmem:[#allocation125_spill] sm:$0xff] }
  0xbd   : > { %696 = vst.msk [vmem:[%s1726_s15 + $0x458] sm:$0xff] %vm556_vm0, %v3184_v10  ;;  %697 = vst.msk [vmem:[%s1726_s15 + $0x460] sm:$0xff] %vm556_vm0, %v3186_v13  ;;  %v3238_v10 = vmax.f32 %v3237_v9, 0.0  ;;  %v3240_v13 = vmax.f32 %v3239_v11, 0.0  ;;  %v3253_v35 = vld [vmem:[#allocation126_spill] sm:$0xff]  ;;  %v3255_v40 = vld [vmem:[#allocation127_spill] sm:$0xff] }
  0xbe   : > { %698 = vst.msk [vmem:[%s1726_s15 + $0x468] sm:$0xff] %vm556_vm0, %v3188_v16  ;;  %699 = vst.msk [vmem:[%s1726_s15 + $0x470] sm:$0xff] %vm556_vm0, %v3190_v21  ;;  %v3242_v16 = vmax.f32 %v3241_v15, 0.0  ;;  %v3244_v21 = vmax.f32 %v3243_v17, 0.0  ;;  %v3257_v45 = vld [vmem:[#allocation128_spill] sm:$0xff]  ;;  %v3259_v47 = vld [vmem:[#allocation129_spill] sm:$0xff] }
  0xbf   : > { %700 = vst.msk [vmem:[%s1726_s15 + $0x478] sm:$0xff] %vm556_vm0, %v3192_v23  ;;  %701 = vst.msk [vmem:[%s1726_s15 + $0x480] sm:$0xff] %vm556_vm0, %v3194_v28  ;;  %v3246_v23 = vmax.f32 %v3245_v22, 0.0  ;;  %v3248_v28 = vmax.f32 %v3247_v27, 0.0  ;;  %v3261_v52 = vld [vmem:[#allocation130_spill] sm:$0xff]  ;;  %v3263_v55 = vld [vmem:[#allocation131_spill] sm:$0xff] }
  0xc0   : > { %702 = vst.msk [vmem:[%s1726_s15 + $0x488] sm:$0xff] %vm556_vm0, %v3196_v30  ;;  %703 = vst.msk [vmem:[%s1726_s15 + $0x490] sm:$0xff] %vm556_vm0, %v3198_v34  ;;  %v3250_v30 = vmax.f32 %v3249_v29, 0.0  ;;  %v3252_v34 = vmax.f32 %v3251_v33, 0.0  ;;  %v3265_v49 = vld [vmem:[#allocation132_spill] sm:$0xff]  ;;  %v3267_v58 = vld [vmem:[#allocation133_spill] sm:$0xff] }
  0xc1   : > { %704 = vst.msk [vmem:[%s1726_s15 + $0x498] sm:$0xff] %vm556_vm0, %v3200_v39  ;;  %705 = vst.msk [vmem:[%s1726_s15 + $0x4a0] sm:$0xff] %vm556_vm0, %v3202_v41  ;;  %v3254_v39 = vmax.f32 %v3253_v35, 0.0  ;;  %v3256_v41 = vmax.f32 %v3255_v40, 0.0  ;;  %v3269_v50 = vld [vmem:[#allocation134_spill] sm:$0xff]  ;;  %v3271_v37 = vld [vmem:[#allocation135_spill] sm:$0xff] }
  0xc2   : > { %706 = vst.msk [vmem:[%s1726_s15 + $0x4a8] sm:$0xff] %vm556_vm0, %v3204_v46  ;;  %707 = vst.msk [vmem:[%s1726_s15 + $0x4b0] sm:$0xff] %vm556_vm0, %v3206_v51  ;;  %v3258_v46 = vmax.f32 %v3257_v45, 0.0  ;;  %v3260_v51 = vmax.f32 %v3259_v47, 0.0  ;;  %v3273_v54 = vld [vmem:[#allocation136_spill] sm:$0xff]  ;;  %v3275_v60 = vld [vmem:[#allocation137_spill] sm:$0xff] }
  0xc3   : > { %708 = vst.msk [vmem:[%s1726_s15 + $0x4b8] sm:$0xff] %vm556_vm0, %v3208_v53  ;;  %709 = vst.msk [vmem:[%s1726_s15 + $0x4c0] sm:$0xff] %vm556_vm0, %v3210_v56  ;;  %v3262_v53 = vmax.f32 %v3261_v52, 0.0  ;;  %v3264_v56 = vmax.f32 %v3263_v55, 0.0  ;;  %v3277_v61 = vld [vmem:[#allocation138_spill] sm:$0xff]  ;;  %v3279_v62 = vld [vmem:[#allocation139_spill] sm:$0xff] }
  0xc4   : > { %710 = vst.msk [vmem:[%s1726_s15 + $0x4c8] sm:$0xff] %vm556_vm0, %v3212_v57  ;;  %711 = vst.msk [vmem:[%s1726_s15 + $0x4d0] sm:$0xff] %vm556_vm0, %v3214_v43  ;;  %v3266_v57 = vmax.f32 %v3265_v49, 0.0  ;;  %v3268_v43 = vmax.f32 %v3267_v58, 0.0  ;;  %v3281_v63 = vld [vmem:[#allocation140_spill] sm:$0xff]  ;;  %v3283_v0 = vld [vmem:[#allocation141_spill] sm:$0xff] }
  0xc5   : > { %712 = vst.msk [vmem:[%s1726_s15 + $0x4d8] sm:$0xff] %vm556_vm0, %v3216_v59  ;;  %713 = vst.msk [vmem:[%s1726_s15 + $0x4e0] sm:$0xff] %vm556_vm0, %v3218_v44  ;;  %v3270_v59 = vmax.f32 %v3269_v50, 0.0  ;;  %v3272_v44 = vmax.f32 %v3271_v37, 0.0  ;;  %v3285_v2 = vld [vmem:[#allocation142_spill] sm:$0xff]  ;;  %v3287_v4 = vld [vmem:[#allocation143_spill] sm:$0xff] }
  0xc6   : > { %714 = vst.msk [vmem:[%s1726_s15 + $0x4e8] sm:$0xff] %vm556_vm0, %v3220_v31  ;;  %715 = vst.msk [vmem:[%s1726_s15 + $0x4f0] sm:$0xff] %vm556_vm0, %v3222_v38  ;;  %v3274_v31 = vmax.f32 %v3273_v54, 0.0  ;;  %v3276_v38 = vmax.f32 %v3275_v60, 0.0  ;;  %v3289_v6 = vld [vmem:[#allocation144_spill] sm:$0xff]  ;;  %v3291_v9 = vld [vmem:[#allocation145_spill] sm:$0xff] }
  0xc7   : > { %716 = vst.msk [vmem:[%s1726_s15 + $0x4f8] sm:$0xff] %vm556_vm0, %v3224_v48  ;;  %717 = vst.msk [vmem:[%s1726_s15 + $0x500] sm:$0xff] %vm556_vm0, %v3226_v25  ;;  %v3278_v48 = vmax.f32 %v3277_v61, 0.0  ;;  %v3280_v25 = vmax.f32 %v3279_v62, 0.0  ;;  %v3293_v11 = vld [vmem:[#allocation146_spill] sm:$0xff]  ;;  %v3295_v15 = vld [vmem:[#allocation147_spill] sm:$0xff] }
  0xc8   : > { %718 = vst.msk [vmem:[%s1726_s15 + $0x508] sm:$0xff] %vm556_vm0, %v3228_v32  ;;  %719 = vst.msk [vmem:[%s1726_s15 + $0x510] sm:$0xff] %vm556_vm0, %v3230_v1  ;;  %v3282_v32 = vmax.f32 %v3281_v63, 0.0  ;;  %v3284_v1 = vmax.f32 %v3283_v0, 0.0  ;;  %v3297_v17 = vld [vmem:[#allocation148_spill] sm:$0xff]  ;;  %v3299_v22 = vld [vmem:[#allocation149_spill] sm:$0xff] }
  0xc9   : > { %720 = vst.msk [vmem:[%s1726_s15 + $0x518] sm:$0xff] %vm556_vm0, %v3232_v3  ;;  %721 = vst.msk [vmem:[%s1726_s15 + $0x520] sm:$0xff] %vm556_vm0, %v3234_v5  ;;  %v3286_v3 = vmax.f32 %v3285_v2, 0.0  ;;  %v3288_v5 = vmax.f32 %v3287_v4, 0.0  ;;  %v3301_v27 = vld [vmem:[#allocation150_spill] sm:$0xff]  ;;  %v3303_v29 = vld [vmem:[#allocation151_spill] sm:$0xff] }
  0xca   : > { %722 = vst.msk [vmem:[%s1726_s15 + $0x528] sm:$0xff] %vm556_vm0, %v3236_v8  ;;  %723 = vst.msk [vmem:[%s1726_s15 + $0x530] sm:$0xff] %vm556_vm0, %v3238_v10  ;;  %v3290_v8 = vmax.f32 %v3289_v6, 0.0  ;;  %v3292_v10 = vmax.f32 %v3291_v9, 0.0  ;;  %v3305_v33 = vld [vmem:[#allocation152_spill] sm:$0xff]  ;;  %v3307_v35 = vmax.f32 %v1686_v7, 0.0 }
  0xcb   : > { %724 = vst.msk [vmem:[%s1726_s15 + $0x538] sm:$0xff] %vm556_vm0, %v3240_v13  ;;  %725 = vst.msk [vmem:[%s1726_s15 + $0x540] sm:$0xff] %vm556_vm0, %v3242_v16  ;;  %v3294_v13 = vmax.f32 %v3293_v11, 0.0  ;;  %v3296_v16 = vmax.f32 %v3295_v15, 0.0  ;;  %v3316_v52 = vld [vmem:[#allocation157_spill] sm:$0xff]  ;;  %v3318_v55 = vld [vmem:[#allocation158_spill] sm:$0xff] }
  0xcc   : > { %726 = vst.msk [vmem:[%s1726_s15 + $0x548] sm:$0xff] %vm556_vm0, %v3244_v21  ;;  %727 = vst.msk [vmem:[%s1726_s15 + $0x550] sm:$0xff] %vm556_vm0, %v3246_v23  ;;  %v3298_v21 = vmax.f32 %v3297_v17, 0.0  ;;  %v3300_v23 = vmax.f32 %v3299_v22, 0.0  ;;  %v3320_v49 = vld [vmem:[#allocation159_spill] sm:$0xff]  ;;  %v3322_v58 = vld [vmem:[#allocation160_spill] sm:$0xff] }
  0xcd   : > { %728 = vst.msk [vmem:[%s1726_s15 + $0x558] sm:$0xff] %vm556_vm0, %v3248_v28  ;;  %729 = vst.msk [vmem:[%s1726_s15 + $0x560] sm:$0xff] %vm556_vm0, %v3250_v30  ;;  %v3302_v28 = vmax.f32 %v3301_v27, 0.0  ;;  %v3304_v30 = vmax.f32 %v3303_v29, 0.0  ;;  %v3324_v50 = vmax.f32 %v1729_v20, 0.0  ;;  %v3326_v37 = vmax.f32 %v1735_v24, 0.0 }
  0xce   : > { %730 = vst.msk [vmem:[%s1726_s15 + $0x568] sm:$0xff] %vm556_vm0, %v3252_v34  ;;  %731 = vst.msk [vmem:[%s1726_s15 + $0x570] sm:$0xff] %vm556_vm0, %v3254_v39  ;;  %v3306_v34 = vmax.f32 %v3305_v33, 0.0  ;;  %v3308_v39 = vld [vmem:[#allocation153_spill] sm:$0xff]  ;;  %v3328_v20 = vmax.f32 %v1744_v19, 0.0 }
  0xcf   : > { %732 = vst.msk [vmem:[%s1726_s15 + $0x578] sm:$0xff] %vm556_vm0, %v3256_v41  ;;  %733 = vst.msk [vmem:[%s1726_s15 + $0x580] sm:$0xff] %vm556_vm0, %v3258_v46  ;;  %v3309_v40 = vmax.f32 %v3308_v39, 0.0  ;;  %v3310_v41 = vld [vmem:[#allocation154_spill] sm:$0xff]  ;;  %v3312_v46 = vld [vmem:[#allocation155_spill] sm:$0xff] }
  0xd0   : > { %734 = vst.msk [vmem:[%s1726_s15 + $0x588] sm:$0xff] %vm556_vm0, %v3260_v51  ;;  %735 = vst.msk [vmem:[%s1726_s15 + $0x590] sm:$0xff] %vm556_vm0, %v3262_v53  ;;  %v3311_v45 = vmax.f32 %v3310_v41, 0.0  ;;  %v3313_v47 = vmax.f32 %v3312_v46, 0.0  ;;  %v3314_v51 = vld [vmem:[#allocation156_spill] sm:$0xff]  ;;  %v3317_v53 = vmax.f32 %v3316_v52, 0.0 }
  0xd1   : > { %736 = vst.msk [vmem:[%s1726_s15 + $0x598] sm:$0xff] %vm556_vm0, %v3264_v56  ;;  %737 = vst.msk [vmem:[%s1726_s15 + $0x5a0] sm:$0xff] %vm556_vm0, %v3266_v57  ;;  %v3315_v7 = vmax.f32 %v3314_v51, 0.0  ;;  %v3319_v56 = vmax.f32 %v3318_v55, 0.0  ;;  %v3321_v57 = vmax.f32 %v3320_v49, 0.0  ;;  %v3327_v54 = vld [vmem:[#allocation161_spill] sm:$0xff] }
  0xd2   : > { %738 = vst.msk [vmem:[%s1726_s15 + $0x5a8] sm:$0xff] %vm556_vm0, %v3268_v43  ;;  %739 = vst.msk [vmem:[%s1726_s15 + $0x5b0] sm:$0xff] %vm556_vm0, %v3270_v59  ;;  %v3323_v43 = vmax.f32 %v3322_v58, 0.0  ;;  %v3325_v59 = vmax.f32 %v1732_v26, 0.0 }
  0xd3   : > { %740 = vst.msk [vmem:[%s1726_s15 + $0x5b8] sm:$0xff] %vm556_vm0, %v3272_v44  ;;  %741 = vst.msk [vmem:[%s1726_s15 + $0x5c0] sm:$0xff] %vm556_vm0, %v3274_v31  ;;  %v554_v44 = vmax.f32 %v1753_v36, 0.0  ;;  %v555_v31 = vmax.f32 %v3327_v54, 0.0 }
  0xd4   : > { %742 = vst.msk [vmem:[%s1726_s15 + $0x5c8] sm:$0xff] %vm556_vm0, %v3276_v38  ;;  %743 = vst.msk [vmem:[%s1726_s15 + $0x5d0] sm:$0xff] %vm556_vm0, %v3278_v48 }
  0xd5   : > { %744 = vst.msk [vmem:[%s1726_s15 + $0x5d8] sm:$0xff] %vm556_vm0, %v3280_v25  ;;  %745 = vst.msk [vmem:[%s1726_s15 + $0x5e0] sm:$0xff] %vm556_vm0, %v3282_v32 }
  0xd6   : > { %746 = vst.msk [vmem:[%s1726_s15 + $0x5e8] sm:$0xff] %vm556_vm0, %v3284_v1  ;;  %747 = vst.msk [vmem:[%s1726_s15 + $0x5f0] sm:$0xff] %vm556_vm0, %v3286_v3 }
  0xd7   : > { %748 = vst.msk [vmem:[%s1726_s15 + $0x5f8] sm:$0xff] %vm556_vm0, %v3288_v5  ;;  %749 = vst.msk [vmem:[%s1726_s15 + $0x600] sm:$0xff] %vm556_vm0, %v3290_v8 }
  0xd8   : > { %750 = vst.msk [vmem:[%s1726_s15 + $0x608] sm:$0xff] %vm556_vm0, %v3292_v10  ;;  %751 = vst.msk [vmem:[%s1726_s15 + $0x610] sm:$0xff] %vm556_vm0, %v3294_v13 }
  0xd9   : > { %752 = vst.msk [vmem:[%s1726_s15 + $0x618] sm:$0xff] %vm556_vm0, %v3296_v16  ;;  %753 = vst.msk [vmem:[%s1726_s15 + $0x620] sm:$0xff] %vm556_vm0, %v3298_v21 }
  0xda   : > { %754 = vst.msk [vmem:[%s1726_s15 + $0x628] sm:$0xff] %vm556_vm0, %v3300_v23  ;;  %755 = vst.msk [vmem:[%s1726_s15 + $0x630] sm:$0xff] %vm556_vm0, %v3302_v28 }
  0xdb   : > { %756 = vst.msk [vmem:[%s1726_s15 + $0x638] sm:$0xff] %vm556_vm0, %v3304_v30  ;;  %757 = vst.msk [vmem:[%s1726_s15 + $0x640] sm:$0xff] %vm556_vm0, %v3306_v34 }
  0xdc   : > { %758 = vst.msk [vmem:[%s1726_s15 + $0x648] sm:$0xff] %vm556_vm0, %v3307_v35  ;;  %759 = vst.msk [vmem:[%s1726_s15 + $0x650] sm:$0xff] %vm556_vm0, %v3309_v40 }
  0xdd   : > { %760 = vst.msk [vmem:[%s1726_s15 + $0x658] sm:$0xff] %vm556_vm0, %v3311_v45  ;;  %761 = vst.msk [vmem:[%s1726_s15 + $0x660] sm:$0xff] %vm556_vm0, %v3313_v47 }
  0xde   : > { %762 = vst.msk [vmem:[%s1726_s15 + $0x668] sm:$0xff] %vm556_vm0, %v3315_v7  ;;  %763 = vst.msk [vmem:[%s1726_s15 + $0x670] sm:$0xff] %vm556_vm0, %v3317_v53 }
  0xdf   : > { %764 = vst.msk [vmem:[%s1726_s15 + $0x678] sm:$0xff] %vm556_vm0, %v3319_v56  ;;  %765 = vst.msk [vmem:[%s1726_s15 + $0x680] sm:$0xff] %vm556_vm0, %v3321_v57 }
  0xe0   : > { %766 = vst.msk [vmem:[%s1726_s15 + $0x688] sm:$0xff] %vm556_vm0, %v3323_v43  ;;  %767 = vst.msk [vmem:[%s1726_s15 + $0x690] sm:$0xff] %vm556_vm0, %v3324_v50 }
  0xe1   : > { %768 = vst.msk [vmem:[%s1726_s15 + $0x698] sm:$0xff] %vm556_vm0, %v3325_v59  ;;  %769 = vst.msk [vmem:[%s1726_s15 + $0x6a0] sm:$0xff] %vm556_vm0, %v3326_v37 }
  0xe2   : > { %770 = vst.msk [vmem:[%s1726_s15 + $0x6a8] sm:$0xff] %vm556_vm0, %v551_v42  ;;  %771 = vst.msk [vmem:[%s1726_s15 + $0x6b0] sm:$0xff] %vm556_vm0, %v3328_v20 }
  0xe3   : > { %772 = vst.msk [vmem:[%s1726_s15 + $0x6b8] sm:$0xff] %vm556_vm0, %v553_v14  ;;  %773 = vst.msk [vmem:[%s1726_s15 + $0x6c0] sm:$0xff] %vm556_vm0, %v554_v44 }
  0xe4   : > { %774 = vst.msk [vmem:[%s1726_s15 + $0x6c8] sm:$0xff] %vm556_vm0, %v555_v31 }
  0xe5 PF: > { %s11_s6 = sadd.s32 1, %s854_s6  }
  0xe6   : > { %p8_p4 = scmp.ge.s32.totalorder %s11_s6, 6  }
  0xe8   :  { %10 = sbr.rel (!%p8_p4) target bundleno = 1 (0x1), region = 54 }

</bundles_post_ra>
